<compile_context>
chip_gen: v7x
topology: tpu7x:2x2x1
jax: 0.10.0
libtpu: 0.0.40
codegen_flags: <defaults>
</compile_context>

<pallas_src>
import jax
import jax.numpy as jnp
from jax.experimental import pallas as pl
from jax.experimental.pallas import tpu as pltpu


def gru_cm_kernel(x_ref, aa_ref, ec_ref, bec_ref, an1_ref, bn1_ref,
                  sw2_ref, wih_ref, b_ih_ref, whh_ref, b_hh_ref, wout_ref,
                  out_ref):
    L, B, N = x_ref.shape
    NH = aa_ref.shape[1]          # N * H (128 for N = 16)
    H = an1_ref.shape[1]
    Hg = whh_ref.shape[0]
    R = L * B                     # (timestep, batch) rows
    M = R * N                     # (timestep, batch, node) rows

    x = x_ref[...].astype(jnp.float32)            # (L, B, N), nodes on lanes
    xr = x.reshape(R, N)                          # free reshape (lanes unchanged)
    x_col = xr[:, :, None]                        # (R, N, 1): small lane->sublane relayout,
                                                  # reused by both edge and node terms

    # ---- fused input_linear + edge MLP, lane-dense (j, h) layout ----
    # c_flat[r, j*H+h] = x[r, j]*(w_in@we2)[h] + (all edge biases)[h]   (MXU expansion)
    c_flat = (jnp.dot(xr, ec_ref[...], preferred_element_type=jnp.float32)
              + bec_ref[...])                                            # (R, NH)
    # e[r, i, j*H+h] = relu(x[r, i]*(w_in@we1)[h] + c_flat[r, j*H+h])    (VPU, fully lane-dense)
    e = jax.nn.relu(x_col * aa_ref[...] + c_flat[:, None, :]).reshape(M, NH)

    # ---- node MLP: relu(h2 @ wn1 + edge_sum @ wn2 + b_n) ----
    # sum over j and the wn2 projection are one MXU matmul: e @ tile(wn2, (N, 1))
    n1 = (x_col * an1_ref[...] + bn1_ref[...]).reshape(M, H)
    node = jax.nn.relu(
        n1 + jnp.dot(e, sw2_ref[...], preferred_element_type=jnp.float32))  # (M, H)

    # ---- max over the node dimension ----
    g = jnp.max(node.reshape(R, N, H), axis=1)                              # (R, H), rows (t, b)

    # ---- GRU (single layer, h0 = 0, gate order [r, z, n]) ----
    xg = jnp.dot(g, wih_ref[...], preferred_element_type=jnp.float32) + b_ih_ref[...]   # (R, 3Hg)
    whh = whh_ref[...]
    b_hh = b_hh_ref[...]
    wout = wout_ref[...]                                                    # (L, Hg)
    h = jnp.zeros((B, Hg), jnp.float32)
    acc = jnp.zeros((B, Hg), jnp.float32)
    # L is small & static -> unrolled Python loop (switch to lax.fori_loop(unroll=True) if L grows)
    for t in range(L):
        hg = jnp.dot(h, whh, preferred_element_type=jnp.float32) + b_hh     # (B, 3Hg) batched matmul
        xt = xg[t * B:(t + 1) * B, :]                                       # contiguous rows of step t
        r = jax.nn.sigmoid(xt[:, 0:Hg] + hg[:, 0:Hg])
        z = jax.nn.sigmoid(xt[:, Hg:2 * Hg] + hg[:, Hg:2 * Hg])
        n = jnp.tanh(xt[:, 2 * Hg:] + r * hg[:, 2 * Hg:])
        h = (1.0 - z) * n + z * h
        # fused output_linear: elementwise accumulate (VPU), single reduction after loop
        acc = acc + h * wout[t:t + 1, :]

    out_ref[...] = jnp.sum(acc, axis=1).reshape(1, B).astype(out_ref.dtype)  # lane-dense (1, B)


def gru_cm_forward(x, params, block_b=None):
    bs, N, L = x.shape
    H = N // 2
    NH = N * H
    Hg = params["w_hh"].shape[0] // 3

    if block_b is None:
        block_b = min(bs, 32)         # batch elements per grid step (VMEM-safe default)
    nblk = pl.cdiv(bs, block_b)
    bs_pad = nblk * block_b

    # time-major (L, bs, N): each timestep is a contiguous row block in the kernel
    x_t = jnp.transpose(x, (2, 0, 1)).astype(jnp.float32)
    if bs_pad != bs:
        x_t = jnp.pad(x_t, ((0, 0), (0, bs_pad - bs), (0, 0)))

    # ---- fold input_linear (1 -> H) into the GNN projections (wrapper-side, f32) ----
    w_in = params["w_in"][:, 0].astype(jnp.float32)      # (H,)
    b_in = params["b_in"].astype(jnp.float32)            # (H,)
    we1 = params["w_e"][:, :H].T                         # (H, H)
    we2 = params["w_e"][:, H:].T
    wn1 = params["w_n"][:, :H].T
    wn2 = params["w_n"][:, H:].T

    Aa = w_in @ we1                                      # x_i coefficient (per h)
    Ac = w_in @ we2                                      # x_j coefficient (per h)
    Be = b_in @ we1 + params["b_e"] + b_in @ we2         # all edge-MLP biases merged (per h)
    An1 = w_in @ wn1
    Bn1 = b_in @ wn1 + params["b_n"]

    aa_t = jnp.tile(Aa, N)[None, :]                      # (1, NH)
    bec_t = jnp.tile(Be, N)[None, :]                     # (1, NH)
    ec = jnp.kron(jnp.eye(N, dtype=jnp.float32), Ac[None, :])   # (N, NH) block-diag expansion
    an1 = An1[None, :]                                   # (1, H)
    bn1 = Bn1[None, :]                                   # (1, H)
    sw2 = jnp.tile(wn2, (N, 1))                          # (NH, H): j-sum + wn2 in one matmul

    wih = params["w_ih"].T                               # (H, 3Hg)
    whh = params["w_hh"].T                               # (Hg, 3Hg)
    b_ih = params["b_ih"][None, :]
    b_hh = params["b_hh"][None, :]
    wout = params["w_out"].reshape(L, Hg)
    b_out = params["b_out"]

    def full(shape):
        return pl.BlockSpec(shape, lambda g, _n=len(shape): (0,) * _n)

    out = pl.pallas_call(
        gru_cm_kernel,
        out_shape=jax.ShapeDtypeStruct((nblk, 1, block_b), jnp.float32),
        grid=(nblk,),
        in_specs=[
            pl.BlockSpec((L, block_b, N), lambda g: (0, g, 0)),
            full((1, NH)),
            full((N, NH)), full((1, NH)),
            full((1, H)), full((1, H)),
            full((NH, H)),
            full((H, 3 * Hg)), full((1, 3 * Hg)),
            full((Hg, 3 * Hg)), full((1, 3 * Hg)),
            full((L, Hg)),
        ],
        out_specs=pl.BlockSpec((None, 1, block_b), lambda g: (g, 0, 0)),
        compiler_params=pltpu.CompilerParams(
            dimension_semantics=("parallel",)),
    )(x_t, aa_t, ec, bec_t, an1, bn1, sw2,
      wih, b_ih, whh, b_hh, wout)

    out = out.reshape(bs_pad)[:bs].reshape(bs, 1)
    return out + b_out[None, :]


def init_params(key, N, L, Hg):
    H = N // 2
    keys = jax.random.split(key, 8)

    def lin(k, out_dim, in_dim):
        bound = 1.0 / float(in_dim) ** 0.5
        kw, kb = jax.random.split(k)
        w = jax.random.uniform(kw, (out_dim, in_dim), jnp.float32, -bound, bound)
        b = jax.random.uniform(kb, (out_dim,), jnp.float32, -bound, bound)
        return w, b

    w_in, b_in = lin(keys[0], H, 1)
    w_e, b_e = lin(keys[1], H, 2 * H)
    w_n, b_n = lin(keys[2], H, 2 * H)
    bound = 1.0 / float(Hg) ** 0.5
    w_ih = jax.random.uniform(keys[3], (3 * Hg, H), jnp.float32, -bound, bound)
    w_hh = jax.random.uniform(keys[4], (3 * Hg, Hg), jnp.float32, -bound, bound)
    b_ih = jax.random.uniform(keys[5], (3 * Hg,), jnp.float32, -bound, bound)
    b_hh = jax.random.uniform(keys[6], (3 * Hg,), jnp.float32, -bound, bound)
    w_out, b_out = lin(keys[7], 1, Hg * L)
    return dict(w_in=w_in, b_in=b_in, w_e=w_e, b_e=b_e, w_n=w_n, b_n=b_n,
                w_ih=w_ih, w_hh=w_hh, b_ih=b_ih, b_hh=b_hh,
                w_out=w_out, b_out=b_out)


def reference(x, params):
    """Pure-JAX re-implementation of the PyTorch forward (eval mode)."""
    bs, N, L = x.shape
    Hg = params["w_hh"].shape[0] // 3
    xp = jnp.transpose(x, (0, 2, 1))[..., None]                      # (bs, L, N, 1)
    h = xp @ params["w_in"].T + params["b_in"]                       # (bs, L, N, H)
    x_i = jnp.repeat(h[:, :, :, None, :], N, axis=3)
    x_j = jnp.repeat(h[:, :, None, :, :], N, axis=2)
    ef = jnp.concatenate([x_i, x_j], axis=-1)
    ef = jax.nn.relu(ef @ params["w_e"].T + params["b_e"])
    es = ef.sum(axis=3)
    nf = jnp.concatenate([h, es], axis=-1)
    nf = jax.nn.relu(nf @ params["w_n"].T + params["b_n"])
    g = nf.max(axis=2)                                               # (bs, L, H)

    def cell(hprev, xt):
        gi = xt @ params["w_ih"].T + params["b_ih"]
        gh = hprev @ params["w_hh"].T + params["b_hh"]
        r = jax.nn.sigmoid(gi[:, :Hg] + gh[:, :Hg])
        z = jax.nn.sigmoid(gi[:, Hg:2 * Hg] + gh[:, Hg:2 * Hg])
        n = jnp.tanh(gi[:, 2 * Hg:] + r * gh[:, 2 * Hg:])
        hnew = (1.0 - z) * n + z * hprev
        return hnew, hnew

    h0 = jnp.zeros((bs, Hg), jnp.float32)
    _, hs = jax.lax.scan(cell, h0, jnp.transpose(g, (1, 0, 2)))
    hs = jnp.transpose(hs, (1, 0, 2))                                # (bs, L, Hg)
    flat = hs.reshape(bs, -1)
    return flat @ params["w_out"].T + params["b_out"]


if __name__ == "__main__":
    bs, N, L, Hg = 2, 16, 8, 32   # time_length=L, num_nodes=N, gru_hidden_dim=Hg
    key = jax.random.PRNGKey(0)
    kx, kp = jax.random.split(key)
    x = jax.random.normal(kx, (bs, N, L), jnp.float32)
    params = init_params(kp, N, L, Hg)

    out = gru_cm_forward(x, params)
    out = jax.block_until_ready(out)

    ref = jax.block_until_ready(reference(x, params))
    assert out.shape == (bs, 1), out.shape
    assert jnp.allclose(out, ref, atol=1e-4, rtol=1e-4), (out, ref)
    print("KERNEL_OK")
</pallas_src>

<mosaic_0001>
module attributes {stable_mosaic.version = 11 : i64} {
  func.func @gru_cm_kernel(%arg0: i32, %arg1: memref<8x2x16xf32, #tpu.memory_space<vmem>>, %arg2: memref<1x128xf32, #tpu.memory_space<vmem>>, %arg3: memref<16x128xf32, #tpu.memory_space<vmem>>, %arg4: memref<1x128xf32, #tpu.memory_space<vmem>>, %arg5: memref<1x8xf32, #tpu.memory_space<vmem>>, %arg6: memref<1x8xf32, #tpu.memory_space<vmem>>, %arg7: memref<128x8xf32, #tpu.memory_space<vmem>>, %arg8: memref<8x96xf32, #tpu.memory_space<vmem>>, %arg9: memref<1x96xf32, #tpu.memory_space<vmem>>, %arg10: memref<32x96xf32, #tpu.memory_space<vmem>>, %arg11: memref<1x96xf32, #tpu.memory_space<vmem>>, %arg12: memref<8x32xf32, #tpu.memory_space<vmem>>, %arg13: memref<1x1x2xf32, #tpu.memory_space<vmem>>) attributes {dimension_semantics = [#tpu.dimension_semantics<parallel>], iteration_bounds = array<i64: 1>, scalar_prefetch = 0 : i64, scratch_operands = 0 : i64, tpu.core_type = #tpu.core_type<tc>, window_params = [{transform_indices = @transform_0, window_bounds = array<i64: 8, 2, 16>}, {pipeline_mode = #tpu.pipeline_mode<synchronous>, transform_indices = @transform_1, window_bounds = array<i64: 1, 128>}, {pipeline_mode = #tpu.pipeline_mode<synchronous>, transform_indices = @transform_2, window_bounds = array<i64: 16, 128>}, {pipeline_mode = #tpu.pipeline_mode<synchronous>, transform_indices = @transform_3, window_bounds = array<i64: 1, 128>}, {pipeline_mode = #tpu.pipeline_mode<synchronous>, transform_indices = @transform_4, window_bounds = array<i64: 1, 8>}, {pipeline_mode = #tpu.pipeline_mode<synchronous>, transform_indices = @transform_5, window_bounds = array<i64: 1, 8>}, {pipeline_mode = #tpu.pipeline_mode<synchronous>, transform_indices = @transform_6, window_bounds = array<i64: 128, 8>}, {pipeline_mode = #tpu.pipeline_mode<synchronous>, transform_indices = @transform_7, window_bounds = array<i64: 8, 96>}, {pipeline_mode = #tpu.pipeline_mode<synchronous>, transform_indices = @transform_8, window_bounds = array<i64: 1, 96>}, {pipeline_mode = #tpu.pipeline_mode<synchronous>, transform_indices = @transform_9, window_bounds = array<i64: 32, 96>}, {pipeline_mode = #tpu.pipeline_mode<synchronous>, transform_indices = @transform_10, window_bounds = array<i64: 1, 96>}, {pipeline_mode = #tpu.pipeline_mode<synchronous>, transform_indices = @transform_11, window_bounds = array<i64: 8, 32>}, {transform_indices = @transform_12, window_bounds = array<i64: 1, 1, 2>}]} {
    %c0 = arith.constant 0 : index
    %c0_0 = arith.constant 0 : index
    %c0_1 = arith.constant 0 : index
    %0 = vector.load %arg1[%c0, %c0_0, %c0_1] : memref<8x2x16xf32, #tpu.memory_space<vmem>>, vector<8x2x16xf32>
    %1 = vector.shape_cast %0 : vector<8x2x16xf32> to vector<16x16xf32>
    %2 = vector.shape_cast %1 : vector<16x16xf32> to vector<16x16x1xf32>
    %c0_2 = arith.constant 0 : index
    %c0_3 = arith.constant 0 : index
    %3 = vector.load %arg3[%c0_2, %c0_3] : memref<16x128xf32, #tpu.memory_space<vmem>>, vector<16x128xf32>
    %cst = arith.constant dense<0.000000e+00> : vector<16x128xf32>
    %4 = tpu.matmul %1, %3, %cst {dimension_numbers = #tpu.dot_dimension_numbers<[1], [0], [0], [1], [0, 0, 1, 1], [], []>} : vector<16x16xf32>, vector<16x128xf32>, vector<16x128xf32> -> vector<16x128xf32>
    %c0_4 = arith.constant 0 : index
    %c0_5 = arith.constant 0 : index
    %5 = vector.load %arg4[%c0_4, %c0_5] : memref<1x128xf32, #tpu.memory_space<vmem>>, vector<1x128xf32>
    %6 = vector.broadcast %5 : vector<1x128xf32> to vector<16x128xf32>
    %7 = arith.addf %4, %6 : vector<16x128xf32>
    %c0_6 = arith.constant 0 : index
    %c0_7 = arith.constant 0 : index
    %8 = vector.load %arg2[%c0_6, %c0_7] : memref<1x128xf32, #tpu.memory_space<vmem>>, vector<1x128xf32>
    %9 = vector.shape_cast %8 : vector<1x128xf32> to vector<1x1x128xf32>
    %10 = vector.broadcast %2 : vector<16x16x1xf32> to vector<16x16x128xf32>
    %11 = vector.broadcast %9 : vector<1x1x128xf32> to vector<16x16x128xf32>
    %12 = arith.mulf %10, %11 : vector<16x16x128xf32>
    %13 = vector.shape_cast %7 : vector<16x128xf32> to vector<16x1x128xf32>
    %14 = vector.broadcast %13 : vector<16x1x128xf32> to vector<16x16x128xf32>
    %15 = arith.addf %12, %14 : vector<16x16x128xf32>
    %cst_8 = arith.constant 0.000000e+00 : f32
    %16 = vector.broadcast %cst_8 : f32 to vector<16x16x128xf32>
    %17 = arith.maximumf %15, %16 : vector<16x16x128xf32>
    %18 = vector.shape_cast %17 : vector<16x16x128xf32> to vector<256x128xf32>
    %c0_9 = arith.constant 0 : index
    %c0_10 = arith.constant 0 : index
    %19 = vector.load %arg5[%c0_9, %c0_10] : memref<1x8xf32, #tpu.memory_space<vmem>>, vector<1x8xf32>
    %20 = vector.shape_cast %19 : vector<1x8xf32> to vector<1x1x8xf32>
    %21 = vector.broadcast %2 : vector<16x16x1xf32> to vector<16x16x8xf32>
    %22 = vector.broadcast %20 : vector<1x1x8xf32> to vector<16x16x8xf32>
    %23 = arith.mulf %21, %22 : vector<16x16x8xf32>
    %c0_11 = arith.constant 0 : index
    %c0_12 = arith.constant 0 : index
    %24 = vector.load %arg6[%c0_11, %c0_12] : memref<1x8xf32, #tpu.memory_space<vmem>>, vector<1x8xf32>
    %25 = vector.shape_cast %24 : vector<1x8xf32> to vector<1x1x8xf32>
    %26 = vector.broadcast %25 : vector<1x1x8xf32> to vector<16x16x8xf32>
    %27 = arith.addf %23, %26 : vector<16x16x8xf32>
    %28 = vector.shape_cast %27 : vector<16x16x8xf32> to vector<256x8xf32>
    %c0_13 = arith.constant 0 : index
    %c0_14 = arith.constant 0 : index
    %29 = vector.load %arg7[%c0_13, %c0_14] : memref<128x8xf32, #tpu.memory_space<vmem>>, vector<128x8xf32>
    %cst_15 = arith.constant dense<0.000000e+00> : vector<256x8xf32>
    %30 = tpu.matmul %18, %29, %cst_15 {dimension_numbers = #tpu.dot_dimension_numbers<[1], [0], [0], [1], [0, 0, 1, 1], [], []>} : vector<256x128xf32>, vector<128x8xf32>, vector<256x8xf32> -> vector<256x8xf32>
    %31 = arith.addf %28, %30 : vector<256x8xf32>
    %cst_16 = arith.constant 0.000000e+00 : f32
    %32 = vector.broadcast %cst_16 : f32 to vector<256x8xf32>
    %33 = arith.maximumf %31, %32 : vector<256x8xf32>
    %34 = vector.shape_cast %33 : vector<256x8xf32> to vector<16x16x8xf32>
    %cst_17 = arith.constant dense<0xFF800000> : vector<16x8xf32>
    %35 = vector.multi_reduction <maximumf>, %34, %cst_17 [1] : vector<16x16x8xf32> to vector<16x8xf32>
    %c0_18 = arith.constant 0 : index
    %c0_19 = arith.constant 0 : index
    %36 = vector.load %arg8[%c0_18, %c0_19] : memref<8x96xf32, #tpu.memory_space<vmem>>, vector<8x96xf32>
    %cst_20 = arith.constant dense<0.000000e+00> : vector<16x96xf32>
    %37 = tpu.matmul %35, %36, %cst_20 {dimension_numbers = #tpu.dot_dimension_numbers<[1], [0], [0], [1], [0, 0, 1, 1], [], []>} : vector<16x8xf32>, vector<8x96xf32>, vector<16x96xf32> -> vector<16x96xf32>
    %c0_21 = arith.constant 0 : index
    %c0_22 = arith.constant 0 : index
    %38 = vector.load %arg9[%c0_21, %c0_22] : memref<1x96xf32, #tpu.memory_space<vmem>>, vector<1x96xf32>
    %39 = vector.broadcast %38 : vector<1x96xf32> to vector<16x96xf32>
    %40 = arith.addf %37, %39 : vector<16x96xf32>
    %c0_23 = arith.constant 0 : index
    %c0_24 = arith.constant 0 : index
    %41 = vector.load %arg10[%c0_23, %c0_24] : memref<32x96xf32, #tpu.memory_space<vmem>>, vector<32x96xf32>
    %c0_25 = arith.constant 0 : index
    %c0_26 = arith.constant 0 : index
    %42 = vector.load %arg11[%c0_25, %c0_26] : memref<1x96xf32, #tpu.memory_space<vmem>>, vector<1x96xf32>
    %c0_27 = arith.constant 0 : index
    %c0_28 = arith.constant 0 : index
    %43 = vector.load %arg12[%c0_27, %c0_28] : memref<8x32xf32, #tpu.memory_space<vmem>>, vector<8x32xf32>
    %cst_29 = arith.constant 0.000000e+00 : f32
    %44 = vector.broadcast %cst_29 : f32 to vector<2x32xf32>
    %cst_30 = arith.constant 0.000000e+00 : f32
    %45 = vector.broadcast %cst_30 : f32 to vector<2x32xf32>
    %cst_31 = arith.constant dense<0.000000e+00> : vector<2x96xf32>
    %46 = tpu.matmul %44, %41, %cst_31 {dimension_numbers = #tpu.dot_dimension_numbers<[1], [0], [0], [1], [0, 0, 1, 1], [], []>} : vector<2x32xf32>, vector<32x96xf32>, vector<2x96xf32> -> vector<2x96xf32>
    %47 = vector.broadcast %42 : vector<1x96xf32> to vector<2x96xf32>
    %48 = arith.addf %46, %47 : vector<2x96xf32>
    %49 = vector.extract_strided_slice %40 {offsets = [0, 0], sizes = [2, 96], strides = [1, 1]} : vector<16x96xf32> to vector<2x96xf32>
    %50 = vector.extract_strided_slice %49 {offsets = [0, 0], sizes = [2, 32], strides = [1, 1]} : vector<2x96xf32> to vector<2x32xf32>
    %51 = vector.extract_strided_slice %48 {offsets = [0, 0], sizes = [2, 32], strides = [1, 1]} : vector<2x96xf32> to vector<2x32xf32>
    %52 = arith.addf %50, %51 : vector<2x32xf32>
    %53 = arith.negf %52 : vector<2x32xf32>
    %54 = math.exp %53 : vector<2x32xf32>
    %cst_32 = arith.constant 1.000000e+00 : f32
    %55 = vector.broadcast %cst_32 : f32 to vector<2x32xf32>
    %56 = arith.addf %55, %54 : vector<2x32xf32>
    %57 = arith.divf %55, %56 : vector<2x32xf32>
    %58 = vector.extract_strided_slice %49 {offsets = [0, 32], sizes = [2, 32], strides = [1, 1]} : vector<2x96xf32> to vector<2x32xf32>
    %59 = vector.extract_strided_slice %48 {offsets = [0, 32], sizes = [2, 32], strides = [1, 1]} : vector<2x96xf32> to vector<2x32xf32>
    %60 = arith.addf %58, %59 : vector<2x32xf32>
    %61 = arith.negf %60 : vector<2x32xf32>
    %62 = math.exp %61 : vector<2x32xf32>
    %cst_33 = arith.constant 1.000000e+00 : f32
    %63 = vector.broadcast %cst_33 : f32 to vector<2x32xf32>
    %64 = arith.addf %63, %62 : vector<2x32xf32>
    %65 = arith.divf %63, %64 : vector<2x32xf32>
    %66 = vector.extract_strided_slice %49 {offsets = [0, 64], sizes = [2, 32], strides = [1, 1]} : vector<2x96xf32> to vector<2x32xf32>
    %67 = vector.extract_strided_slice %48 {offsets = [0, 64], sizes = [2, 32], strides = [1, 1]} : vector<2x96xf32> to vector<2x32xf32>
    %68 = arith.mulf %57, %67 : vector<2x32xf32>
    %69 = arith.addf %66, %68 : vector<2x32xf32>
    %70 = math.tanh %69 : vector<2x32xf32>
    %cst_34 = arith.constant 1.000000e+00 : f32
    %71 = vector.broadcast %cst_34 : f32 to vector<2x32xf32>
    %72 = arith.subf %71, %65 : vector<2x32xf32>
    %73 = arith.mulf %72, %70 : vector<2x32xf32>
    %74 = arith.mulf %65, %44 : vector<2x32xf32>
    %75 = arith.addf %73, %74 : vector<2x32xf32>
    %76 = vector.extract_strided_slice %43 {offsets = [0, 0], sizes = [1, 32], strides = [1, 1]} : vector<8x32xf32> to vector<1x32xf32>
    %77 = vector.broadcast %76 : vector<1x32xf32> to vector<2x32xf32>
    %78 = arith.mulf %75, %77 : vector<2x32xf32>
    %79 = arith.addf %45, %78 : vector<2x32xf32>
    %cst_35 = arith.constant dense<0.000000e+00> : vector<2x96xf32>
    %80 = tpu.matmul %75, %41, %cst_35 {dimension_numbers = #tpu.dot_dimension_numbers<[1], [0], [0], [1], [0, 0, 1, 1], [], []>} : vector<2x32xf32>, vector<32x96xf32>, vector<2x96xf32> -> vector<2x96xf32>
    %81 = vector.broadcast %42 : vector<1x96xf32> to vector<2x96xf32>
    %82 = arith.addf %80, %81 : vector<2x96xf32>
    %83 = vector.extract_strided_slice %40 {offsets = [2, 0], sizes = [2, 96], strides = [1, 1]} : vector<16x96xf32> to vector<2x96xf32>
    %84 = vector.extract_strided_slice %83 {offsets = [0, 0], sizes = [2, 32], strides = [1, 1]} : vector<2x96xf32> to vector<2x32xf32>
    %85 = vector.extract_strided_slice %82 {offsets = [0, 0], sizes = [2, 32], strides = [1, 1]} : vector<2x96xf32> to vector<2x32xf32>
    %86 = arith.addf %84, %85 : vector<2x32xf32>
    %87 = arith.negf %86 : vector<2x32xf32>
    %88 = math.exp %87 : vector<2x32xf32>
    %cst_36 = arith.constant 1.000000e+00 : f32
    %89 = vector.broadcast %cst_36 : f32 to vector<2x32xf32>
    %90 = arith.addf %89, %88 : vector<2x32xf32>
    %91 = arith.divf %89, %90 : vector<2x32xf32>
    %92 = vector.extract_strided_slice %83 {offsets = [0, 32], sizes = [2, 32], strides = [1, 1]} : vector<2x96xf32> to vector<2x32xf32>
    %93 = vector.extract_strided_slice %82 {offsets = [0, 32], sizes = [2, 32], strides = [1, 1]} : vector<2x96xf32> to vector<2x32xf32>
    %94 = arith.addf %92, %93 : vector<2x32xf32>
    %95 = arith.negf %94 : vector<2x32xf32>
    %96 = math.exp %95 : vector<2x32xf32>
    %cst_37 = arith.constant 1.000000e+00 : f32
    %97 = vector.broadcast %cst_37 : f32 to vector<2x32xf32>
    %98 = arith.addf %97, %96 : vector<2x32xf32>
    %99 = arith.divf %97, %98 : vector<2x32xf32>
    %100 = vector.extract_strided_slice %83 {offsets = [0, 64], sizes = [2, 32], strides = [1, 1]} : vector<2x96xf32> to vector<2x32xf32>
    %101 = vector.extract_strided_slice %82 {offsets = [0, 64], sizes = [2, 32], strides = [1, 1]} : vector<2x96xf32> to vector<2x32xf32>
    %102 = arith.mulf %91, %101 : vector<2x32xf32>
    %103 = arith.addf %100, %102 : vector<2x32xf32>
    %104 = math.tanh %103 : vector<2x32xf32>
    %cst_38 = arith.constant 1.000000e+00 : f32
    %105 = vector.broadcast %cst_38 : f32 to vector<2x32xf32>
    %106 = arith.subf %105, %99 : vector<2x32xf32>
    %107 = arith.mulf %106, %104 : vector<2x32xf32>
    %108 = arith.mulf %99, %75 : vector<2x32xf32>
    %109 = arith.addf %107, %108 : vector<2x32xf32>
    %110 = vector.extract_strided_slice %43 {offsets = [1, 0], sizes = [1, 32], strides = [1, 1]} : vector<8x32xf32> to vector<1x32xf32>
    %111 = vector.broadcast %110 : vector<1x32xf32> to vector<2x32xf32>
    %112 = arith.mulf %109, %111 : vector<2x32xf32>
    %113 = arith.addf %79, %112 : vector<2x32xf32>
    %cst_39 = arith.constant dense<0.000000e+00> : vector<2x96xf32>
    %114 = tpu.matmul %109, %41, %cst_39 {dimension_numbers = #tpu.dot_dimension_numbers<[1], [0], [0], [1], [0, 0, 1, 1], [], []>} : vector<2x32xf32>, vector<32x96xf32>, vector<2x96xf32> -> vector<2x96xf32>
    %115 = vector.broadcast %42 : vector<1x96xf32> to vector<2x96xf32>
    %116 = arith.addf %114, %115 : vector<2x96xf32>
    %117 = vector.extract_strided_slice %40 {offsets = [4, 0], sizes = [2, 96], strides = [1, 1]} : vector<16x96xf32> to vector<2x96xf32>
    %118 = vector.extract_strided_slice %117 {offsets = [0, 0], sizes = [2, 32], strides = [1, 1]} : vector<2x96xf32> to vector<2x32xf32>
    %119 = vector.extract_strided_slice %116 {offsets = [0, 0], sizes = [2, 32], strides = [1, 1]} : vector<2x96xf32> to vector<2x32xf32>
    %120 = arith.addf %118, %119 : vector<2x32xf32>
    %121 = arith.negf %120 : vector<2x32xf32>
    %122 = math.exp %121 : vector<2x32xf32>
    %cst_40 = arith.constant 1.000000e+00 : f32
    %123 = vector.broadcast %cst_40 : f32 to vector<2x32xf32>
    %124 = arith.addf %123, %122 : vector<2x32xf32>
    %125 = arith.divf %123, %124 : vector<2x32xf32>
    %126 = vector.extract_strided_slice %117 {offsets = [0, 32], sizes = [2, 32], strides = [1, 1]} : vector<2x96xf32> to vector<2x32xf32>
    %127 = vector.extract_strided_slice %116 {offsets = [0, 32], sizes = [2, 32], strides = [1, 1]} : vector<2x96xf32> to vector<2x32xf32>
    %128 = arith.addf %126, %127 : vector<2x32xf32>
    %129 = arith.negf %128 : vector<2x32xf32>
    %130 = math.exp %129 : vector<2x32xf32>
    %cst_41 = arith.constant 1.000000e+00 : f32
    %131 = vector.broadcast %cst_41 : f32 to vector<2x32xf32>
    %132 = arith.addf %131, %130 : vector<2x32xf32>
    %133 = arith.divf %131, %132 : vector<2x32xf32>
    %134 = vector.extract_strided_slice %117 {offsets = [0, 64], sizes = [2, 32], strides = [1, 1]} : vector<2x96xf32> to vector<2x32xf32>
    %135 = vector.extract_strided_slice %116 {offsets = [0, 64], sizes = [2, 32], strides = [1, 1]} : vector<2x96xf32> to vector<2x32xf32>
    %136 = arith.mulf %125, %135 : vector<2x32xf32>
    %137 = arith.addf %134, %136 : vector<2x32xf32>
    %138 = math.tanh %137 : vector<2x32xf32>
    %cst_42 = arith.constant 1.000000e+00 : f32
    %139 = vector.broadcast %cst_42 : f32 to vector<2x32xf32>
    %140 = arith.subf %139, %133 : vector<2x32xf32>
    %141 = arith.mulf %140, %138 : vector<2x32xf32>
    %142 = arith.mulf %133, %109 : vector<2x32xf32>
    %143 = arith.addf %141, %142 : vector<2x32xf32>
    %144 = vector.extract_strided_slice %43 {offsets = [2, 0], sizes = [1, 32], strides = [1, 1]} : vector<8x32xf32> to vector<1x32xf32>
    %145 = vector.broadcast %144 : vector<1x32xf32> to vector<2x32xf32>
    %146 = arith.mulf %143, %145 : vector<2x32xf32>
    %147 = arith.addf %113, %146 : vector<2x32xf32>
    %cst_43 = arith.constant dense<0.000000e+00> : vector<2x96xf32>
    %148 = tpu.matmul %143, %41, %cst_43 {dimension_numbers = #tpu.dot_dimension_numbers<[1], [0], [0], [1], [0, 0, 1, 1], [], []>} : vector<2x32xf32>, vector<32x96xf32>, vector<2x96xf32> -> vector<2x96xf32>
    %149 = vector.broadcast %42 : vector<1x96xf32> to vector<2x96xf32>
    %150 = arith.addf %148, %149 : vector<2x96xf32>
    %151 = vector.extract_strided_slice %40 {offsets = [6, 0], sizes = [2, 96], strides = [1, 1]} : vector<16x96xf32> to vector<2x96xf32>
    %152 = vector.extract_strided_slice %151 {offsets = [0, 0], sizes = [2, 32], strides = [1, 1]} : vector<2x96xf32> to vector<2x32xf32>
    %153 = vector.extract_strided_slice %150 {offsets = [0, 0], sizes = [2, 32], strides = [1, 1]} : vector<2x96xf32> to vector<2x32xf32>
    %154 = arith.addf %152, %153 : vector<2x32xf32>
    %155 = arith.negf %154 : vector<2x32xf32>
    %156 = math.exp %155 : vector<2x32xf32>
    %cst_44 = arith.constant 1.000000e+00 : f32
    %157 = vector.broadcast %cst_44 : f32 to vector<2x32xf32>
    %158 = arith.addf %157, %156 : vector<2x32xf32>
    %159 = arith.divf %157, %158 : vector<2x32xf32>
    %160 = vector.extract_strided_slice %151 {offsets = [0, 32], sizes = [2, 32], strides = [1, 1]} : vector<2x96xf32> to vector<2x32xf32>
    %161 = vector.extract_strided_slice %150 {offsets = [0, 32], sizes = [2, 32], strides = [1, 1]} : vector<2x96xf32> to vector<2x32xf32>
    %162 = arith.addf %160, %161 : vector<2x32xf32>
    %163 = arith.negf %162 : vector<2x32xf32>
    %164 = math.exp %163 : vector<2x32xf32>
    %cst_45 = arith.constant 1.000000e+00 : f32
    %165 = vector.broadcast %cst_45 : f32 to vector<2x32xf32>
    %166 = arith.addf %165, %164 : vector<2x32xf32>
    %167 = arith.divf %165, %166 : vector<2x32xf32>
    %168 = vector.extract_strided_slice %151 {offsets = [0, 64], sizes = [2, 32], strides = [1, 1]} : vector<2x96xf32> to vector<2x32xf32>
    %169 = vector.extract_strided_slice %150 {offsets = [0, 64], sizes = [2, 32], strides = [1, 1]} : vector<2x96xf32> to vector<2x32xf32>
    %170 = arith.mulf %159, %169 : vector<2x32xf32>
    %171 = arith.addf %168, %170 : vector<2x32xf32>
    %172 = math.tanh %171 : vector<2x32xf32>
    %cst_46 = arith.constant 1.000000e+00 : f32
    %173 = vector.broadcast %cst_46 : f32 to vector<2x32xf32>
    %174 = arith.subf %173, %167 : vector<2x32xf32>
    %175 = arith.mulf %174, %172 : vector<2x32xf32>
    %176 = arith.mulf %167, %143 : vector<2x32xf32>
    %177 = arith.addf %175, %176 : vector<2x32xf32>
    %178 = vector.extract_strided_slice %43 {offsets = [3, 0], sizes = [1, 32], strides = [1, 1]} : vector<8x32xf32> to vector<1x32xf32>
    %179 = vector.broadcast %178 : vector<1x32xf32> to vector<2x32xf32>
    %180 = arith.mulf %177, %179 : vector<2x32xf32>
    %181 = arith.addf %147, %180 : vector<2x32xf32>
    %cst_47 = arith.constant dense<0.000000e+00> : vector<2x96xf32>
    %182 = tpu.matmul %177, %41, %cst_47 {dimension_numbers = #tpu.dot_dimension_numbers<[1], [0], [0], [1], [0, 0, 1, 1], [], []>} : vector<2x32xf32>, vector<32x96xf32>, vector<2x96xf32> -> vector<2x96xf32>
    %183 = vector.broadcast %42 : vector<1x96xf32> to vector<2x96xf32>
    %184 = arith.addf %182, %183 : vector<2x96xf32>
    %185 = vector.extract_strided_slice %40 {offsets = [8, 0], sizes = [2, 96], strides = [1, 1]} : vector<16x96xf32> to vector<2x96xf32>
    %186 = vector.extract_strided_slice %185 {offsets = [0, 0], sizes = [2, 32], strides = [1, 1]} : vector<2x96xf32> to vector<2x32xf32>
    %187 = vector.extract_strided_slice %184 {offsets = [0, 0], sizes = [2, 32], strides = [1, 1]} : vector<2x96xf32> to vector<2x32xf32>
    %188 = arith.addf %186, %187 : vector<2x32xf32>
    %189 = arith.negf %188 : vector<2x32xf32>
    %190 = math.exp %189 : vector<2x32xf32>
    %cst_48 = arith.constant 1.000000e+00 : f32
    %191 = vector.broadcast %cst_48 : f32 to vector<2x32xf32>
    %192 = arith.addf %191, %190 : vector<2x32xf32>
    %193 = arith.divf %191, %192 : vector<2x32xf32>
    %194 = vector.extract_strided_slice %185 {offsets = [0, 32], sizes = [2, 32], strides = [1, 1]} : vector<2x96xf32> to vector<2x32xf32>
    %195 = vector.extract_strided_slice %184 {offsets = [0, 32], sizes = [2, 32], strides = [1, 1]} : vector<2x96xf32> to vector<2x32xf32>
    %196 = arith.addf %194, %195 : vector<2x32xf32>
    %197 = arith.negf %196 : vector<2x32xf32>
    %198 = math.exp %197 : vector<2x32xf32>
    %cst_49 = arith.constant 1.000000e+00 : f32
    %199 = vector.broadcast %cst_49 : f32 to vector<2x32xf32>
    %200 = arith.addf %199, %198 : vector<2x32xf32>
    %201 = arith.divf %199, %200 : vector<2x32xf32>
    %202 = vector.extract_strided_slice %185 {offsets = [0, 64], sizes = [2, 32], strides = [1, 1]} : vector<2x96xf32> to vector<2x32xf32>
    %203 = vector.extract_strided_slice %184 {offsets = [0, 64], sizes = [2, 32], strides = [1, 1]} : vector<2x96xf32> to vector<2x32xf32>
    %204 = arith.mulf %193, %203 : vector<2x32xf32>
    %205 = arith.addf %202, %204 : vector<2x32xf32>
    %206 = math.tanh %205 : vector<2x32xf32>
    %cst_50 = arith.constant 1.000000e+00 : f32
    %207 = vector.broadcast %cst_50 : f32 to vector<2x32xf32>
    %208 = arith.subf %207, %201 : vector<2x32xf32>
    %209 = arith.mulf %208, %206 : vector<2x32xf32>
    %210 = arith.mulf %201, %177 : vector<2x32xf32>
    %211 = arith.addf %209, %210 : vector<2x32xf32>
    %212 = vector.extract_strided_slice %43 {offsets = [4, 0], sizes = [1, 32], strides = [1, 1]} : vector<8x32xf32> to vector<1x32xf32>
    %213 = vector.broadcast %212 : vector<1x32xf32> to vector<2x32xf32>
    %214 = arith.mulf %211, %213 : vector<2x32xf32>
    %215 = arith.addf %181, %214 : vector<2x32xf32>
    %cst_51 = arith.constant dense<0.000000e+00> : vector<2x96xf32>
    %216 = tpu.matmul %211, %41, %cst_51 {dimension_numbers = #tpu.dot_dimension_numbers<[1], [0], [0], [1], [0, 0, 1, 1], [], []>} : vector<2x32xf32>, vector<32x96xf32>, vector<2x96xf32> -> vector<2x96xf32>
    %217 = vector.broadcast %42 : vector<1x96xf32> to vector<2x96xf32>
    %218 = arith.addf %216, %217 : vector<2x96xf32>
    %219 = vector.extract_strided_slice %40 {offsets = [10, 0], sizes = [2, 96], strides = [1, 1]} : vector<16x96xf32> to vector<2x96xf32>
    %220 = vector.extract_strided_slice %219 {offsets = [0, 0], sizes = [2, 32], strides = [1, 1]} : vector<2x96xf32> to vector<2x32xf32>
    %221 = vector.extract_strided_slice %218 {offsets = [0, 0], sizes = [2, 32], strides = [1, 1]} : vector<2x96xf32> to vector<2x32xf32>
    %222 = arith.addf %220, %221 : vector<2x32xf32>
    %223 = arith.negf %222 : vector<2x32xf32>
    %224 = math.exp %223 : vector<2x32xf32>
    %cst_52 = arith.constant 1.000000e+00 : f32
    %225 = vector.broadcast %cst_52 : f32 to vector<2x32xf32>
    %226 = arith.addf %225, %224 : vector<2x32xf32>
    %227 = arith.divf %225, %226 : vector<2x32xf32>
    %228 = vector.extract_strided_slice %219 {offsets = [0, 32], sizes = [2, 32], strides = [1, 1]} : vector<2x96xf32> to vector<2x32xf32>
    %229 = vector.extract_strided_slice %218 {offsets = [0, 32], sizes = [2, 32], strides = [1, 1]} : vector<2x96xf32> to vector<2x32xf32>
    %230 = arith.addf %228, %229 : vector<2x32xf32>
    %231 = arith.negf %230 : vector<2x32xf32>
    %232 = math.exp %231 : vector<2x32xf32>
    %cst_53 = arith.constant 1.000000e+00 : f32
    %233 = vector.broadcast %cst_53 : f32 to vector<2x32xf32>
    %234 = arith.addf %233, %232 : vector<2x32xf32>
    %235 = arith.divf %233, %234 : vector<2x32xf32>
    %236 = vector.extract_strided_slice %219 {offsets = [0, 64], sizes = [2, 32], strides = [1, 1]} : vector<2x96xf32> to vector<2x32xf32>
    %237 = vector.extract_strided_slice %218 {offsets = [0, 64], sizes = [2, 32], strides = [1, 1]} : vector<2x96xf32> to vector<2x32xf32>
    %238 = arith.mulf %227, %237 : vector<2x32xf32>
    %239 = arith.addf %236, %238 : vector<2x32xf32>
    %240 = math.tanh %239 : vector<2x32xf32>
    %cst_54 = arith.constant 1.000000e+00 : f32
    %241 = vector.broadcast %cst_54 : f32 to vector<2x32xf32>
    %242 = arith.subf %241, %235 : vector<2x32xf32>
    %243 = arith.mulf %242, %240 : vector<2x32xf32>
    %244 = arith.mulf %235, %211 : vector<2x32xf32>
    %245 = arith.addf %243, %244 : vector<2x32xf32>
    %246 = vector.extract_strided_slice %43 {offsets = [5, 0], sizes = [1, 32], strides = [1, 1]} : vector<8x32xf32> to vector<1x32xf32>
    %247 = vector.broadcast %246 : vector<1x32xf32> to vector<2x32xf32>
    %248 = arith.mulf %245, %247 : vector<2x32xf32>
    %249 = arith.addf %215, %248 : vector<2x32xf32>
    %cst_55 = arith.constant dense<0.000000e+00> : vector<2x96xf32>
    %250 = tpu.matmul %245, %41, %cst_55 {dimension_numbers = #tpu.dot_dimension_numbers<[1], [0], [0], [1], [0, 0, 1, 1], [], []>} : vector<2x32xf32>, vector<32x96xf32>, vector<2x96xf32> -> vector<2x96xf32>
    %251 = vector.broadcast %42 : vector<1x96xf32> to vector<2x96xf32>
    %252 = arith.addf %250, %251 : vector<2x96xf32>
    %253 = vector.extract_strided_slice %40 {offsets = [12, 0], sizes = [2, 96], strides = [1, 1]} : vector<16x96xf32> to vector<2x96xf32>
    %254 = vector.extract_strided_slice %253 {offsets = [0, 0], sizes = [2, 32], strides = [1, 1]} : vector<2x96xf32> to vector<2x32xf32>
    %255 = vector.extract_strided_slice %252 {offsets = [0, 0], sizes = [2, 32], strides = [1, 1]} : vector<2x96xf32> to vector<2x32xf32>
    %256 = arith.addf %254, %255 : vector<2x32xf32>
    %257 = arith.negf %256 : vector<2x32xf32>
    %258 = math.exp %257 : vector<2x32xf32>
    %cst_56 = arith.constant 1.000000e+00 : f32
    %259 = vector.broadcast %cst_56 : f32 to vector<2x32xf32>
    %260 = arith.addf %259, %258 : vector<2x32xf32>
    %261 = arith.divf %259, %260 : vector<2x32xf32>
    %262 = vector.extract_strided_slice %253 {offsets = [0, 32], sizes = [2, 32], strides = [1, 1]} : vector<2x96xf32> to vector<2x32xf32>
    %263 = vector.extract_strided_slice %252 {offsets = [0, 32], sizes = [2, 32], strides = [1, 1]} : vector<2x96xf32> to vector<2x32xf32>
    %264 = arith.addf %262, %263 : vector<2x32xf32>
    %265 = arith.negf %264 : vector<2x32xf32>
    %266 = math.exp %265 : vector<2x32xf32>
    %cst_57 = arith.constant 1.000000e+00 : f32
    %267 = vector.broadcast %cst_57 : f32 to vector<2x32xf32>
    %268 = arith.addf %267, %266 : vector<2x32xf32>
    %269 = arith.divf %267, %268 : vector<2x32xf32>
    %270 = vector.extract_strided_slice %253 {offsets = [0, 64], sizes = [2, 32], strides = [1, 1]} : vector<2x96xf32> to vector<2x32xf32>
    %271 = vector.extract_strided_slice %252 {offsets = [0, 64], sizes = [2, 32], strides = [1, 1]} : vector<2x96xf32> to vector<2x32xf32>
    %272 = arith.mulf %261, %271 : vector<2x32xf32>
    %273 = arith.addf %270, %272 : vector<2x32xf32>
    %274 = math.tanh %273 : vector<2x32xf32>
    %cst_58 = arith.constant 1.000000e+00 : f32
    %275 = vector.broadcast %cst_58 : f32 to vector<2x32xf32>
    %276 = arith.subf %275, %269 : vector<2x32xf32>
    %277 = arith.mulf %276, %274 : vector<2x32xf32>
    %278 = arith.mulf %269, %245 : vector<2x32xf32>
    %279 = arith.addf %277, %278 : vector<2x32xf32>
    %280 = vector.extract_strided_slice %43 {offsets = [6, 0], sizes = [1, 32], strides = [1, 1]} : vector<8x32xf32> to vector<1x32xf32>
    %281 = vector.broadcast %280 : vector<1x32xf32> to vector<2x32xf32>
    %282 = arith.mulf %279, %281 : vector<2x32xf32>
    %283 = arith.addf %249, %282 : vector<2x32xf32>
    %cst_59 = arith.constant dense<0.000000e+00> : vector<2x96xf32>
    %284 = tpu.matmul %279, %41, %cst_59 {dimension_numbers = #tpu.dot_dimension_numbers<[1], [0], [0], [1], [0, 0, 1, 1], [], []>} : vector<2x32xf32>, vector<32x96xf32>, vector<2x96xf32> -> vector<2x96xf32>
    %285 = vector.broadcast %42 : vector<1x96xf32> to vector<2x96xf32>
    %286 = arith.addf %284, %285 : vector<2x96xf32>
    %287 = vector.extract_strided_slice %40 {offsets = [14, 0], sizes = [2, 96], strides = [1, 1]} : vector<16x96xf32> to vector<2x96xf32>
    %288 = vector.extract_strided_slice %287 {offsets = [0, 0], sizes = [2, 32], strides = [1, 1]} : vector<2x96xf32> to vector<2x32xf32>
    %289 = vector.extract_strided_slice %286 {offsets = [0, 0], sizes = [2, 32], strides = [1, 1]} : vector<2x96xf32> to vector<2x32xf32>
    %290 = arith.addf %288, %289 : vector<2x32xf32>
    %291 = arith.negf %290 : vector<2x32xf32>
    %292 = math.exp %291 : vector<2x32xf32>
    %cst_60 = arith.constant 1.000000e+00 : f32
    %293 = vector.broadcast %cst_60 : f32 to vector<2x32xf32>
    %294 = arith.addf %293, %292 : vector<2x32xf32>
    %295 = arith.divf %293, %294 : vector<2x32xf32>
    %296 = vector.extract_strided_slice %287 {offsets = [0, 32], sizes = [2, 32], strides = [1, 1]} : vector<2x96xf32> to vector<2x32xf32>
    %297 = vector.extract_strided_slice %286 {offsets = [0, 32], sizes = [2, 32], strides = [1, 1]} : vector<2x96xf32> to vector<2x32xf32>
    %298 = arith.addf %296, %297 : vector<2x32xf32>
    %299 = arith.negf %298 : vector<2x32xf32>
    %300 = math.exp %299 : vector<2x32xf32>
    %cst_61 = arith.constant 1.000000e+00 : f32
    %301 = vector.broadcast %cst_61 : f32 to vector<2x32xf32>
    %302 = arith.addf %301, %300 : vector<2x32xf32>
    %303 = arith.divf %301, %302 : vector<2x32xf32>
    %304 = vector.extract_strided_slice %287 {offsets = [0, 64], sizes = [2, 32], strides = [1, 1]} : vector<2x96xf32> to vector<2x32xf32>
    %305 = vector.extract_strided_slice %286 {offsets = [0, 64], sizes = [2, 32], strides = [1, 1]} : vector<2x96xf32> to vector<2x32xf32>
    %306 = arith.mulf %295, %305 : vector<2x32xf32>
    %307 = arith.addf %304, %306 : vector<2x32xf32>
    %308 = math.tanh %307 : vector<2x32xf32>
    %cst_62 = arith.constant 1.000000e+00 : f32
    %309 = vector.broadcast %cst_62 : f32 to vector<2x32xf32>
    %310 = arith.subf %309, %303 : vector<2x32xf32>
    %311 = arith.mulf %310, %308 : vector<2x32xf32>
    %312 = arith.mulf %303, %279 : vector<2x32xf32>
    %313 = arith.addf %311, %312 : vector<2x32xf32>
    %314 = vector.extract_strided_slice %43 {offsets = [7, 0], sizes = [1, 32], strides = [1, 1]} : vector<8x32xf32> to vector<1x32xf32>
    %315 = vector.broadcast %314 : vector<1x32xf32> to vector<2x32xf32>
    %316 = arith.mulf %313, %315 : vector<2x32xf32>
    %317 = arith.addf %283, %316 : vector<2x32xf32>
    %cst_63 = arith.constant dense<0.000000e+00> : vector<2xf32>
    %318 = vector.multi_reduction <add>, %317, %cst_63 [1] : vector<2x32xf32> to vector<2xf32>
    %319 = vector.shape_cast %318 : vector<2xf32> to vector<1x2xf32>
    %c0_64 = arith.constant 0 : index
    %c0_65 = arith.constant 0 : index
    %c0_66 = arith.constant 0 : index
    %320 = vector.load %arg13[%c0_64, %c0_65, %c0_66] : memref<1x1x2xf32, #tpu.memory_space<vmem>>, vector<1x1x2xf32>
    %321 = vector.shape_cast %320 : vector<1x1x2xf32> to vector<1x2xf32>
    %322 = vector.shape_cast %319 : vector<1x2xf32> to vector<1x1x2xf32>
    tpu.vector_store %arg13[%c0_64, %c0_65, %c0_66], %322 {strides = array<i32>} : memref<1x1x2xf32, #tpu.memory_space<vmem>>, vector<1x1x2xf32>,
    return
  }
  func.func @transform_0(%arg0: i32) -> (i32, i32, i32) {
    %c0_i32 = arith.constant 0 : i32
    %c0_i32_0 = arith.constant 0 : i32
    %c0_i32_1 = arith.constant 0 : i32
    return %c0_i32, %arg0, %c0_i32_0 : i32, i32, i32
  }
  func.func @transform_1(%arg0: i32) -> (i32, i32) {
    %c0_i32 = arith.constant 0 : i32
    %c0_i32_0 = arith.constant 0 : i32
    %c0_i32_1 = arith.constant 0 : i32
    return %c0_i32, %c0_i32_0 : i32, i32
  }
  func.func @transform_2(%arg0: i32) -> (i32, i32) {
    %c0_i32 = arith.constant 0 : i32
    %c0_i32_0 = arith.constant 0 : i32
    %c0_i32_1 = arith.constant 0 : i32
    return %c0_i32, %c0_i32_0 : i32, i32
  }
  func.func @transform_3(%arg0: i32) -> (i32, i32) {
    %c0_i32 = arith.constant 0 : i32
    %c0_i32_0 = arith.constant 0 : i32
    %c0_i32_1 = arith.constant 0 : i32
    return %c0_i32, %c0_i32_0 : i32, i32
  }
  func.func @transform_4(%arg0: i32) -> (i32, i32) {
    %c0_i32 = arith.constant 0 : i32
    %c0_i32_0 = arith.constant 0 : i32
    %c0_i32_1 = arith.constant 0 : i32
    return %c0_i32, %c0_i32_0 : i32, i32
  }
  func.func @transform_5(%arg0: i32) -> (i32, i32) {
    %c0_i32 = arith.constant 0 : i32
    %c0_i32_0 = arith.constant 0 : i32
    %c0_i32_1 = arith.constant 0 : i32
    return %c0_i32, %c0_i32_0 : i32, i32
  }
  func.func @transform_6(%arg0: i32) -> (i32, i32) {
    %c0_i32 = arith.constant 0 : i32
    %c0_i32_0 = arith.constant 0 : i32
    %c0_i32_1 = arith.constant 0 : i32
    return %c0_i32, %c0_i32_0 : i32, i32
  }
  func.func @transform_7(%arg0: i32) -> (i32, i32) {
    %c0_i32 = arith.constant 0 : i32
    %c0_i32_0 = arith.constant 0 : i32
    %c0_i32_1 = arith.constant 0 : i32
    return %c0_i32, %c0_i32_0 : i32, i32
  }
  func.func @transform_8(%arg0: i32) -> (i32, i32) {
    %c0_i32 = arith.constant 0 : i32
    %c0_i32_0 = arith.constant 0 : i32
    %c0_i32_1 = arith.constant 0 : i32
    return %c0_i32, %c0_i32_0 : i32, i32
  }
  func.func @transform_9(%arg0: i32) -> (i32, i32) {
    %c0_i32 = arith.constant 0 : i32
    %c0_i32_0 = arith.constant 0 : i32
    %c0_i32_1 = arith.constant 0 : i32
    return %c0_i32, %c0_i32_0 : i32, i32
  }
  func.func @transform_10(%arg0: i32) -> (i32, i32) {
    %c0_i32 = arith.constant 0 : i32
    %c0_i32_0 = arith.constant 0 : i32
    %c0_i32_1 = arith.constant 0 : i32
    return %c0_i32, %c0_i32_0 : i32, i32
  }
  func.func @transform_11(%arg0: i32) -> (i32, i32) {
    %c0_i32 = arith.constant 0 : i32
    %c0_i32_0 = arith.constant 0 : i32
    %c0_i32_1 = arith.constant 0 : i32
    return %c0_i32, %c0_i32_0 : i32, i32
  }
  func.func @transform_12(%arg0: i32) -> (i32, i32, i32) {
    %c0_i32 = arith.constant 0 : i32
    %c0_i32_0 = arith.constant 0 : i32
    %c0_i32_1 = arith.constant 0 : i32
    return %arg0, %c0_i32, %c0_i32_0 : i32, i32, i32
  }
}

</mosaic_0001>

<bundles_post_ra>
// kernel: tpu_custom_call.1
= control target key start
LH: loop header
LB: loop body
LE: loop exit
PB: predicated region body
PF: predicated region fallthrough
CT: control target
= control target key end

     0   :  { %v50_v3 = vlaneseq  ;;  %v2736_v8 = vmov 1983009808   ;;  %s3516_s0 = inlined_call_operand.vmem [shape: f32[8,2,16], index: 0, kind: input, shape index: {}]   ;;  %s3517_s1 = inlined_call_operand.vmem [shape: f32[1,128], index: 1, kind: input, shape index: {}]   ;;  %s3518_s2 = inlined_call_operand.vmem [shape: f32[16,128], index: 2, kind: input, shape index: {}]   ;;  %s3519_s3 = inlined_call_operand.vmem [shape: f32[1,128], index: 3, kind: input, shape index: {}]   ;;  %s3520_s4 = inlined_call_operand.vmem [shape: f32[1,8], index: 4, kind: input, shape index: {}]   ;;  %s3521_s5 = inlined_call_operand.vmem [shape: f32[1,8], index: 5, kind: input, shape index: {}]   ;;  %s3522_s6 = inlined_call_operand.vmem [shape: f32[128,8], index: 6, kind: input, shape index: {}]   ;;  %s3523_s7 = inlined_call_operand.vmem [shape: f32[8,96], index: 7, kind: input, shape index: {}]   ;;  %s3524_s8 = inlined_call_operand.vmem [shape: f32[1,96], index: 8, kind: input, shape index: {}]   ;;  %s3525_s9 = inlined_call_operand.vmem [shape: f32[32,96], index: 9, kind: input, shape index: {}]   ;;  %s3526_s10 = inlined_call_operand.vmem [shape: f32[1,96], index: 10, kind: input, shape index: {}]   ;;  %s3527_s11 = inlined_call_operand.vmem [shape: f32[8,32], index: 11, kind: input, shape index: {}]   ;;  %s3528_s12 = inlined_call_operand.hbm [shape: f32[1,1,2], index: 12, kind: output, shape index: {}]  }
   0x1   :  { %v226_v0 = vld [vmem:[%s3518_s2] sm:$0xff]  ;;  %v227_v1 = vld [vmem:[%s3518_s2 + $0x8] sm:$0xff]  ;;  %v246_v9 = vunpack.c.l.s4 %v2736_v8 }
   0x2   :  { %v42_v2 = vld [vmem:[%s3516_s0] sm:$0x3]  ;;  %v2571_v4 = vpack.c.bf16 %v227_v1, %v226_v0  ;;  %v43_v5 = vld [vmem:[%s3516_s0 + $0x2] sm:$0x3]  ;;  %v44_v6 = vld [vmem:[%s3516_s0 + $0x4] sm:$0x3] }
   0x3   :  { %v45_v7 = vld [vmem:[%s3516_s0 + $0x6] sm:$0x3]  ;;  %v2829_v10 = vshrl.u32 %v50_v3, 7  ;;  %v2834_v11 = vld [vmem:[%s3516_s0 + $0x8] sm:$0x3]  ;;  %v243_v13 = vcombine.low %v42_v2, %v43_v5  ;;  %v247_v15 = vunpack.c.0.s8 %v246_v9 }
   0x4   :  { %v2839_v12 = vld [vmem:[%s3516_s0 + $0xa] sm:$0x3]  ;;  %2572 = vmatprep.subr.bf16.mxu0 %v2571_v4  ;;  %v244_v14 = vcombine.low %v44_v6, %v45_v7  ;;  %v2844_v16 = vld [vmem:[%s3516_s0 + $0xc] sm:$0x3]  ;;  %v2849_v17 = vld [vmem:[%s3516_s0 + $0xe] sm:$0x3] }
   0x5   :  { %v260_v18 = vcombine.low %v2834_v11, %v2839_v12  ;;  %2574 = vmatpush3.bf16.msra.mxu0 %v2571_v4  ;;  %v2854_v19 = vsub.s32 0, %v2829_v10  ;;  %v261_v20 = vcombine.low %v2844_v16, %v2849_v17  ;;  %v2859_v21 = vsub.s32 1, %v2829_v10 }
   0x6   :  { %17 = vsyncpa [#allocation3], 0  ;;  %v250_v22 = vsub.s32 %v247_v15, %v2829_v10  ;;  %vm277_vm0 = vcmask 130048   ;;  %v718_v35 = vld [vmem:[%s3522_s6] sm:$0xff]  ;;  %v719_v36 = vld [vmem:[%s3522_s6 + $0x8] sm:$0xff]  ;;  %vm1023_vm1 = vcmask 64512  }
   0x7   :  { %v64_v23 = vrot.slane %v42_v2, %v2859_v21  ;;  %v53_v24 = vrot.slane %v42_v2, %v2854_v19  ;;  %v75_v31 = vrot.slane %v43_v5, %v2854_v19  ;;  %v86_v32 = vrot.slane %v43_v5, %v2859_v21  ;;  %v720_v39 = vld [vmem:[%s3522_s6 + $0x10] sm:$0xff]  ;;  %v721_v40 = vld [vmem:[%s3522_s6 + $0x18] sm:$0xff]  ;;  %v722_v43 = vld [vmem:[%s3522_s6 + $0x20] sm:$0xff]  ;;  %s2741_s28 = smov 64   ;;  %s2743_s30 = smov 32  }
   0x8   :  { %v251_v25 = vrot.slane %v243_v13, %v250_v22  ;;  %v258_v26 = vrot.slane %v244_v14, %v250_v22  ;;  %v268_v27 = vrot.slane %v260_v18, %v250_v22  ;;  %v275_v28 = vrot.slane %v261_v20, %v250_v22  ;;  %v723_v44 = vld [vmem:[%s3522_s6 + $0x28] sm:$0xff]  ;;  %v724_v47 = vld [vmem:[%s3522_s6 + $0x30] sm:$0xff]  ;;  %v725_v48 = vld [vmem:[%s3522_s6 + $0x38] sm:$0xff] }
   0x9   :  { %66 = vbcast.lane.b32.xlu1 %v64_v23, 256  ;;  %55 = vbcast.lane.b32.xlu0 %v53_v24, 256  ;;  %v97_v33 = vrot.slane %v44_v6, %v2854_v19  ;;  %v108_v34 = vrot.slane %v44_v6, %v2859_v21  ;;  %v2575_v37 = vpack.c.bf16 %v719_v36, %v718_v35  ;;  %v726_v51 = vld [vmem:[%s3522_s6 + $0x40] sm:$0xff]  ;;  %v727_v52 = vld [vmem:[%s3522_s6 + $0x48] sm:$0xff]  ;;  %v728_v60 = vld [vmem:[%s3522_s6 + $0x50] sm:$0xff]  ;;  %vm1192_vm2 = vcmask 1041409  }
   0xa   :  { %v259_v29 = vcombine.low %v251_v25, %v258_v26  ;;  %v276_v30 = vcombine.low %v268_v27, %v275_v28  ;;  %v119_v38 = vrot.slane %v45_v7, %v2854_v19  ;;  %v2579_v41 = vpack.c.bf16 %v721_v40, %v720_v39  ;;  %v729_v61 = vld [vmem:[%s3522_s6 + $0x58] sm:$0xff]  ;;  %v730_v63 = vld [vmem:[%s3522_s6 + $0x60] sm:$0xff]  ;;  %v731_v0 = vld [vmem:[%s3522_s6 + $0x68] sm:$0xff] }
   0xb   :  { %2576 = vmatprep.subr.bf16.mxu1 %v2575_v37  ;;  %v130_v42 = vrot.slane %v45_v7, %v2859_v21  ;;  %v2583_v45 = vpack.c.bf16 %v723_v44, %v722_v43  ;;  %v141_v46 = vrot.slane %v2834_v11, %v2854_v19  ;;  %v2587_v49 = vpack.c.bf16 %v725_v48, %v724_v47  ;;  %v732_v2 = vld [vmem:[%s3522_s6 + $0x70] sm:$0xff]  ;;  %v733_v4 = vld [vmem:[%s3522_s6 + $0x78] sm:$0xff]  ;;  %v2271_v22 = vld [vmem:[%s3519_s3] ss:$0 sm:$0xff] }
   0xc   :  { %2395 = vmatprep.mubr.msk.f32.mxu0 %vm277_vm0, %v259_v29  ;;  %2578 = vmatpush3.bf16.msra.mxu1 %v2575_v37  ;;  %v152_v50 = vrot.slane %v2834_v11, %v2859_v21  ;;  %v2591_v53 = vpack.c.bf16 %v727_v52, %v726_v51  ;;  %v163_v54 = vrot.slane %v2839_v12, %v2854_v19  ;;  %v2737_v15 = vmov 1966171168  }
   0xd   :  { %2396 = vmatmul.mubr.msk.f32.vlgmr.msra.gmra.mrb[0].mxu0 %vm277_vm0, %v276_v30  ;;  %70 = vbcast.lane.b32.xlu1 %v64_v23, 264  ;;  %v174_v55 = vrot.slane %v2839_v12, %v2859_v21  ;;  %v185_v56 = vrot.slane %v2844_v16, %v2854_v19  ;;  %v196_v57 = vrot.slane %v2844_v16, %v2859_v21  ;;  %v400_v16 = vunpack.c.l.s4 %v2737_v15 }
   0xe   :  { %59 = vbcast.lane.b32.xlu0 %v53_v24, 264  ;;  %2580 = vmatprep.subr.bf16.mxu1 %v2579_v41  ;;  %v207_v58 = vrot.slane %v2849_v17, %v2854_v19  ;;  %v218_v59 = vrot.slane %v2849_v17, %v2859_v21  ;;  %v2595_v62 = vpack.c.bf16 %v729_v61, %v728_v60  ;;  %vm1194_vm3 = vcmask 1042434  }
   0xf   :  { %v2599_v1 = vpack.c.bf16 %v731_v0, %v730_v63  ;;  %v2603_v5 = vpack.c.bf16 %v733_v4, %v732_v2  ;;  %v401_v18 = vunpack.c.0.s8 %v400_v16  ;;  %vm1196_vm4 = vcmask 1043459  }
  0x10   :  { %2582 = vmatpush3.bf16.msra.mxu1 %v2579_v41  ;;  %vm1198_vm5 = vcmask 1044484   ;;  %vm1200_vm6 = vcmask 1045509   ;;  %vm1202_vm7 = vcmask 1046534   ;;  %vm1204_vm8 = vcmask 1047559  }
  0x11   :  { %81 = vbcast.lane.b32.xlu1 %v75_v31, 264  ;;  %2584 = vmatprep.subr.bf16.mxu1 %v2583_v45  ;;  %v2958_v24 = vsub.s32 %v401_v18, %v2829_v10  ;;  %vm2739_vm9 = vmmov 0   ;;  %vm1304_vm10 = vcmask 261120   ;;  %vm2243_vm11 = vcmask 254976  }
  0x12   :  { %77 = vbcast.lane.b32.xlu0 %v75_v31, 256  ;;  %vm2255_vm12 = vcmask 8192  }
  0x14   :  { %2586 = vmatpush3.bf16.msra.mxu1 %v2583_v45 }
  0x15   :  { %92 = vbcast.lane.b32.xlu1 %v86_v32, 264  ;;  %2588 = vmatprep.subr.bf16.mxu1 %v2587_v49 }
  0x16   :  { %88 = vbcast.lane.b32.xlu0 %v86_v32, 256  ;;  %v2969_v32 = vld [vmem:[%s3517_s1] ss:$0 sm:$0xff] }
  0x18   :  { %2590 = vmatpush3.bf16.msra.mxu1 %v2587_v49 }
  0x19   :  { %103 = vbcast.lane.b32.xlu1 %v97_v33, 264  ;;  %2592 = vmatprep.subr.bf16.mxu1 %v2591_v53 }
  0x1a   :  { %99 = vbcast.lane.b32.xlu0 %v97_v33, 256 }
  0x1c   :  { %2594 = vmatpush3.bf16.msra.mxu1 %v2591_v53 }
  0x1d   :  { %114 = vbcast.lane.b32.xlu1 %v108_v34, 264  ;;  %2596 = vmatprep.subr.bf16.mxu1 %v2595_v62 }
  0x1e   :  { %110 = vbcast.lane.b32.xlu0 %v108_v34, 256 }
  0x20   :  { %2598 = vmatpush3.bf16.msra.mxu1 %v2595_v62 }
  0x21   :  { %125 = vbcast.lane.b32.xlu1 %v119_v38, 264  ;;  %2600 = vmatprep.subr.bf16.mxu1 %v2599_v1 }
  0x22   :  { %121 = vbcast.lane.b32.xlu0 %v119_v38, 256 }
  0x24   :  { %2602 = vmatpush3.bf16.msra.mxu1 %v2599_v1 }
  0x25   :  { %136 = vbcast.lane.b32.xlu1 %v130_v42, 264  ;;  %2604 = vmatprep.subr.bf16.mxu1 %v2603_v5 }
  0x26   :  { %132 = vbcast.lane.b32.xlu0 %v130_v42, 256 }
  0x28   :  { %2606 = vmatpush3.bf16.msra.mxu1 %v2603_v5 }
  0x29   :  { %147 = vbcast.lane.b32.xlu1 %v141_v46, 264 }
  0x2a   :  { %143 = vbcast.lane.b32.xlu0 %v141_v46, 256 }
  0x2d   :  { %158 = vbcast.lane.b32.xlu1 %v152_v50, 264 }
  0x2e   :  { %154 = vbcast.lane.b32.xlu0 %v152_v50, 256 }
  0x31   :  { %169 = vbcast.lane.b32.xlu1 %v163_v54, 264 }
  0x32   :  { %165 = vbcast.lane.b32.xlu0 %v163_v54, 256 }
  0x35   :  { %180 = vbcast.lane.b32.xlu1 %v174_v55, 264 }
  0x36   :  { %176 = vbcast.lane.b32.xlu0 %v174_v55, 256 }
  0x39   :  { %191 = vbcast.lane.b32.xlu1 %v185_v56, 264 }
  0x3a   :  { %187 = vbcast.lane.b32.xlu0 %v185_v56, 256 }
  0x3d   :  { %202 = vbcast.lane.b32.xlu1 %v196_v57, 264 }
  0x3e   :  { %198 = vbcast.lane.b32.xlu0 %v196_v57, 256 }
  0x41   :  { %213 = vbcast.lane.b32.xlu1 %v207_v58, 264 }
  0x42   :  { %209 = vbcast.lane.b32.xlu0 %v207_v58, 256 }
  0x45   :  { %224 = vbcast.lane.b32.xlu1 %v218_v59, 264 }
  0x46   :  { %220 = vbcast.lane.b32.xlu0 %v218_v59, 256 }
  0x7b   :  { %v2934_v6 = vpop.permute.xlu0 %55  ;;  %v2936_v7 = vpop.permute.xlu1 %66 }
  0x7c   :  { %v366_v35 = vmul.f32 %v2969_v32, %v2936_v7  ;;  %v364_v40 = vmul.f32 %v2969_v32, %v2934_v6 }
  0x7f   :  { %v2940_v9 = vpop.permute.xlu1 %70 }
  0x80   :  { %v2938_v8 = vpop.permute.xlu0 %59  ;;  %v367_v43 = vmul.f32 %v2969_v32, %v2940_v9 }
  0x81   :  { %v365_v36 = vmul.f32 %v2969_v32, %v2938_v8 }
  0x83   :  { %v2944_v12 = vpop.permute.xlu1 %81 }
  0x84   :  { %v2942_v11 = vpop.permute.xlu0 %77  ;;  %v369_v55 = vmul.f32 %v2969_v32, %v2944_v12 }
  0x85   :  { %v368_v44 = vmul.f32 %v2969_v32, %v2942_v11 }
  0x87   :  { %v2948_v14 = vpop.permute.xlu1 %92 }
  0x88   :  { %v2946_v13 = vpop.permute.xlu0 %88  ;;  %v371_v63 = vmul.f32 %v2969_v32, %v2948_v14 }
  0x89   :  { %v370_v56 = vmul.f32 %v2969_v32, %v2946_v13 }
  0x8b   :  { %v2952_v20 = vpop.permute.xlu1 %103 }
  0x8c   :  { %v2950_v17 = vpop.permute.xlu0 %99 }
  0x8d   :  { %v372_v0 = vmul.f32 %v2969_v32, %v2950_v17 }
  0x8f   :  { %v2962_v28 = vpop.permute.xlu1 %114 }
  0x90   :  { %v2960_v25 = vpop.permute.xlu0 %110 }
  0x93   :  { %v2981_v41 = vpop.permute.xlu1 %125 }
  0x94   :  { %v2971_v33 = vpop.permute.xlu0 %121 }
  0x97   :  { %v2996_v58 = vpop.permute.xlu1 %136 }
  0x98   :  { %v2990_v51 = vpop.permute.xlu0 %132 }
  0x9c   :  { %v3004_v1 = vpop.permute.xlu0 %143 }
  0xe0   :  { %v2397_v23 = vpop.f32.mrb[0].mxu0 }
  0xe1   :  { %v348_v26 = vpop.f32.mrb[1].mxu0 }
  0xe2   :  { %v349_v27 = vadd.f32 %v2271_v22, %v348_v26  ;;  %v373_v26 = vmul.f32 %v2969_v32, %v2952_v20 }
  0xe4   :  { %v405_v29 = vrot.slane %v349_v27, %v2958_v24  ;;  %v398_v34 = vcombine.high %v349_v27, %v349_v27  ;;  %v3010_v27 = vpop.permute.xlu1 %147 }
  0xe6   :  { %v413_v30 = vcombine.high %v405_v29, %v405_v29  ;;  %v421_v31 = vrot.slane %v405_v29, %v2958_v24  ;;  %v412_v45 = vrot.slane %v398_v34, %v2958_v24  ;;  %v374_v29 = vmul.f32 %v2969_v32, %v2960_v25 }
  0xe8   :  { %v435_v37 = vrot.slane %v413_v30, %v2958_v24  ;;  %v443_v38 = vcombine.high %v421_v31, %v421_v31  ;;  %v499_v39 = vrot.slane %v421_v31, %v2854_v19  ;;  %v414_v59 = vcombine.high %v412_v45, %v412_v45 }
  0xe9   :  { %v428_v60 = vrot.slane %v412_v45, %v2958_v24  ;;  %v354_v30 = vadd.f32 %v2397_v23, %v2271_v22 }
  0xea   :  { %v503_v42 = vrot.slane %v435_v37, %v2854_v19  ;;  %v507_v46 = vrot.slane %v443_v38, %v2854_v19  ;;  %v576_v47 = vadd.f32 %v499_v39, %v364_v40  ;;  %v577_v48 = vadd.f32 %v499_v39, %v365_v36  ;;  %v3015_v39 = vpop.permute.xlu0 %154 }
  0xeb   :  { %v445_v50 = vcombine.high %v435_v37, %v435_v37  ;;  %v515_v16 = vrot.slane %v428_v60, %v2854_v19  ;;  %v442_v18 = vrot.slane %v414_v59, %v2958_v24  ;;  %v444_v38 = vcombine.high %v428_v60, %v428_v60 }
  0xec   :  { %v578_v49 = vadd.f32 %v503_v42, %v366_v35  ;;  %v608_v52 = vmax.f32 %v576_v47, 0.0  ;;  %v609_v53 = vmax.f32 %v577_v48, 0.0  ;;  %v579_v57 = vadd.f32 %v503_v42, %v367_v43 }
  0xed   :  { %v580_v61 = vadd.f32 %v507_v46, %v368_v44  ;;  %v511_v62 = vrot.slane %v445_v50, %v2854_v19  ;;  %v581_v4 = vadd.f32 %v507_v46, %v369_v55  ;;  %v584_v36 = vadd.f32 %v515_v16, %v372_v0  ;;  %v3022_v44 = vpop.permute.xlu1 %158 }
  0xee   :  { %v610_v54 = vmax.f32 %v578_v49, 0.0  ;;  %2430 = vmatprep.mubr.f32.mxu1 %v608_v52  ;;  %v611_v2 = vmax.f32 %v579_v57, 0.0  ;;  %v519_v37 = vrot.slane %v442_v18, %v2854_v19  ;;  %v375_v40 = vmul.f32 %v2969_v32, %v2962_v28  ;;  %v3029_v52 = vpop.permute.xlu0 %165 }
  0xef   :  { %2431 = vmatmul.mubr.f32.vlgmr.msra.gmra.mrb[0].mxu1 %v609_v53  ;;  %v612_v5 = vmax.f32 %v580_v61, 0.0  ;;  %v582_v15 = vadd.f32 %v511_v62, %v370_v56  ;;  %v613_v31 = vmax.f32 %v581_v4, 0.0  ;;  %v583_v34 = vadd.f32 %v511_v62, %v371_v63 }
  0xf0   :  { %2433 = vmatprep.mubr.f32.mxu1 %v610_v54  ;;  %v376_v42 = vmul.f32 %v2969_v32, %v2971_v33  ;;  %v454_v43 = vrot.slane %v354_v30, %v2958_v24  ;;  %v585_v23 = vadd.f32 %v515_v16, %v373_v26  ;;  %v616_v45 = vmax.f32 %v584_v36, 0.0 }
  0xf1   :  { %v614_v35 = vmax.f32 %v582_v15, 0.0  ;;  %v615_v22 = vmax.f32 %v583_v34, 0.0  ;;  %v586_v46 = vadd.f32 %v519_v37, %v374_v29  ;;  %v523_v47 = vrot.slane %v444_v38, %v2854_v19  ;;  %v3033_v61 = vpop.permute.xlu1 %169 }
  0xf2   :  { %v446_v48 = vcombine.high %v442_v18, %v442_v18  ;;  %v377_v49 = vmul.f32 %v2969_v32, %v2981_v41  ;;  %v378_v50 = vmul.f32 %v2969_v32, %v2990_v51  ;;  %v462_v53 = vcombine.high %v454_v43, %v454_v43  ;;  %v3041_v18 = vpop.permute.xlu0 %176 }
  0xf3   :  { %2434 = vmatmul.mubr.f32.gmra.mrb[2].mxu1 %v611_v2  ;;  %v617_v54 = vmax.f32 %v585_v23, 0.0  ;;  %v587_v55 = vadd.f32 %v519_v37, %v375_v40  ;;  %v470_v56 = vrot.slane %v454_v43, %v2958_v24  ;;  %v618_v57 = vmax.f32 %v586_v46, 0.0 }
  0xf4   :  { %2436 = vmatprep.mubr.f32.mxu1 %v612_v5  ;;  %v588_v59 = vadd.f32 %v523_v47, %v376_v42  ;;  %v527_v60 = vrot.slane %v446_v48, %v2854_v19  ;;  %v379_v62 = vmul.f32 %v2969_v32, %v2996_v58  ;;  %v380_v63 = vmul.f32 %v2969_v32, %v3004_v1 }
  0xf5   :  { %v619_v0 = vmax.f32 %v587_v55, 0.0  ;;  %v589_v2 = vadd.f32 %v523_v47, %v377_v49  ;;  %v484_v4 = vrot.slane %v462_v53, %v2958_v24  ;;  %v531_v16 = vrot.slane %v470_v56, %v2854_v19  ;;  %v3047_v36 = vpop.permute.xlu1 %180 }
  0xf6   :  { %v620_v5 = vmax.f32 %v588_v59, 0.0  ;;  %v590_v15 = vadd.f32 %v527_v60, %v378_v50  ;;  %v381_v26 = vmul.f32 %v2969_v32, %v3010_v27  ;;  %v382_v29 = vmul.f32 %v2969_v32, %v3015_v39 }
  0xf7   :  { %2437 = vmatmul.mubr.f32.gmra.mrb[4].mxu1 %v613_v31  ;;  %v447_v31 = vcombine.high %v354_v30, %v354_v30  ;;  %v621_v34 = vmax.f32 %v589_v2, 0.0  ;;  %v492_v37 = vcombine.high %v470_v56, %v470_v56  ;;  %v592_v40 = vadd.f32 %v531_v16, %v380_v63  ;;  %v3055_v30 = vpop.permute.xlu0 %187 }
  0xf8   :  { %2439 = vmatprep.mubr.f32.mxu1 %v614_v35  ;;  %v591_v35 = vadd.f32 %v527_v60, %v379_v62  ;;  %v622_v38 = vmax.f32 %v590_v15, 0.0  ;;  %v535_v42 = vrot.slane %v484_v4, %v2854_v19  ;;  %v383_v43 = vmul.f32 %v2969_v32, %v3022_v44 }
  0xf9   :  { %v461_v23 = vrot.slane %v447_v31, %v2958_v24  ;;  %v593_v46 = vadd.f32 %v531_v16, %v381_v26  ;;  %v624_v47 = vmax.f32 %v592_v40, 0.0  ;;  %v539_v49 = vrot.slane %v492_v37, %v2854_v19 }
  0xfa   :  { %v594_v48 = vadd.f32 %v535_v42, %v382_v29  ;;  %v494_v50 = vcombine.high %v484_v4, %v484_v4  ;;  %v385_v53 = vmul.f32 %v2969_v32, %v3033_v61  ;;  %v386_v55 = vmul.f32 %v2969_v32, %v3041_v18 }
  0xfb   :  { %2440 = vmatmul.mubr.f32.gmra.mrb[6].mxu1 %v615_v22  ;;  %v384_v22 = vmul.f32 %v2969_v32, %v3029_v52  ;;  %v463_v56 = vcombine.high %v461_v23, %v461_v23  ;;  %v595_v59 = vadd.f32 %v535_v42, %v383_v43  ;;  %v477_v60 = vrot.slane %v461_v23, %v2958_v24  ;;  %v3066_v2 = vpop.permute.xlu0 %198 }
  0xfc   :  { %2442 = vmatprep.mubr.f32.mxu1 %v616_v45  ;;  %v623_v45 = vmax.f32 %v591_v35, 0.0  ;;  %v626_v62 = vmax.f32 %v594_v48, 0.0  ;;  %v387_v4 = vmul.f32 %v2969_v32, %v3047_v36  ;;  %v597_v16 = vadd.f32 %v539_v49, %v385_v53 }
  0xfd   :  { %v596_v63 = vadd.f32 %v539_v49, %v384_v22  ;;  %v627_v15 = vmax.f32 %v595_v59, 0.0  ;;  %v547_v26 = vrot.slane %v477_v60, %v2854_v19  ;;  %v491_v29 = vrot.slane %v463_v56, %v2958_v24 }
  0xfe   :  { %v629_v42 = vmax.f32 %v597_v16, 0.0  ;;  %v493_v24 = vcombine.high %v477_v60, %v477_v60 }
  0xff   :  { %2443 = vmatmul.mubr.f32.gmra.mrb[8].mxu1 %v617_v54  ;;  %v3060_v54 = vpop.permute.xlu1 %191  ;;  %v3080_v40 = vpop.permute.xlu0 %209  ;;  %v551_v23 = vrot.slane %v491_v29, %v2854_v19  ;;  %v495_v56 = vcombine.high %v491_v29, %v491_v29 }
 0x100   :  { %2445 = vmatprep.mubr.f32.mxu1 %v618_v57  ;;  %v625_v57 = vmax.f32 %v593_v46, 0.0  ;;  %v389_v37 = vmul.f32 %v2969_v32, %v3060_v54  ;;  %v392_v49 = vmul.f32 %v2969_v32, %v3080_v40 }
 0x103   :  { %2446 = vmatmul.mubr.f32.gmra.mrb[10].mxu1 %v619_v0  ;;  %v543_v0 = vrot.slane %v494_v50, %v2854_v19  ;;  %v3074_v31 = vpop.permute.xlu1 %202  ;;  %v3090_v59 = vpop.permute.xlu0 %220 }
 0x104   :  { %2448 = vmatprep.mubr.f32.mxu1 %v620_v5  ;;  %v388_v5 = vmul.f32 %v2969_v32, %v3055_v30  ;;  %v391_v48 = vmul.f32 %v2969_v32, %v3074_v31 }
 0x105   :  { %v598_v35 = vadd.f32 %v543_v0, %v386_v55  ;;  %v599_v43 = vadd.f32 %v543_v0, %v387_v4  ;;  %v555_v55 = vrot.slane %v493_v24, %v2854_v19  ;;  %v559_v4 = vrot.slane %v495_v56, %v2854_v19 }
 0x106   :  { %v600_v22 = vadd.f32 %v547_v26, %v388_v5  ;;  %v603_v60 = vadd.f32 %v551_v23, %v391_v48  ;;  %v2738_v24 = vmov 0.0|0.0  }
 0x107   :  { %2449 = vmatmul.mubr.f32.gmra.mrb[12].mxu1 %v621_v34  ;;  %v628_v34 = vmax.f32 %v596_v63, 0.0  ;;  %v3083_v46 = vpop.permute.xlu1 %213  ;;  %v631_v50 = vmax.f32 %v599_v43, 0.0  ;;  %v604_v0 = vadd.f32 %v555_v55, %v392_v49 }
 0x108   :  { %2451 = vmatprep.mubr.f32.mxu1 %v622_v38  ;;  %v390_v38 = vmul.f32 %v2969_v32, %v3066_v2 }
 0x10a   :  { %v602_v53 = vadd.f32 %v551_v23, %v390_v38  ;;  %v1168_v23 = vld [vmem:[%s3523_s7] sm:$0xff] }
 0x10b   :  { %2452 = vmatmul.mubr.f32.gmra.mrb[14].mxu1 %v623_v45  ;;  %v630_v45 = vmax.f32 %v598_v35, 0.0  ;;  %v3095_v5 = vpop.permute.xlu1 %224  ;;  %2478 = vmatprep.subr.mxu0 %v1168_v23 }
 0x10c   :  { %2454 = vmatprep.mubr.f32.mxu1 %v624_v47  ;;  %v601_v47 = vadd.f32 %v547_v26, %v389_v37  ;;  %v634_v16 = vmax.f32 %v602_v53, 0.0  ;;  %v395_v29 = vmul.f32 %v2969_v32, %v3095_v5  ;;  %v636_v37 = vmax.f32 %v604_v0, 0.0  ;;  %2479 = vmatpush3.msra.mxu0 %v1168_v23 }
 0x10d   :  { %2607 = vmatprep.subr.bf16.mxu0 %v2738_v24 }
 0x10e   :  { %v633_v63 = vmax.f32 %v601_v47, 0.0  ;;  %v607_v38 = vadd.f32 %v559_v4, %v395_v29 }
 0x10f   :  { %2455 = vmatmul.mubr.f32.gmra.mrb[16].mxu1 %v625_v57  ;;  %v632_v57 = vmax.f32 %v600_v22, 0.0 }
 0x110   :  { %2457 = vmatprep.mubr.f32.mxu1 %v626_v62  ;;  %v393_v62 = vmul.f32 %v2969_v32, %v3083_v46  ;;  %v639_v22 = vmax.f32 %v607_v38, 0.0 }
 0x112   :  { %v605_v26 = vadd.f32 %v555_v55, %v393_v62 }
 0x113   :  { %2458 = vmatmul.mubr.f32.gmra.mrb[18].mxu1 %v627_v15  ;;  %v394_v15 = vmul.f32 %v2969_v32, %v3090_v59  ;;  %v3108_v32 = vld [vmem:[%s3520_s4] ss:$0 sm:$0xff] }
 0x114   :  { %2460 = vmatprep.mubr.f32.mxu1 %v628_v34  ;;  %v635_v34 = vmax.f32 %v603_v60, 0.0  ;;  %v649_v47 = vmul.f32 %v3108_v32, %v2936_v7  ;;  %v647_v48 = vmul.f32 %v3108_v32, %v2934_v6  ;;  %v650_v49 = vmul.f32 %v3108_v32, %v2940_v9 }
 0x115   :  { %v606_v35 = vadd.f32 %v559_v4, %v394_v15  ;;  %v651_v53 = vmul.f32 %v3108_v32, %v2942_v11  ;;  %v654_v55 = vmul.f32 %v3108_v32, %v2948_v14  ;;  %v653_v6 = vmul.f32 %v3108_v32, %v2946_v13 }
 0x116   :  { %v656_v7 = vmul.f32 %v3108_v32, %v2952_v20  ;;  %v655_v60 = vmul.f32 %v3108_v32, %v2950_v17  ;;  %v658_v0 = vmul.f32 %v3108_v32, %v2962_v28  ;;  %v662_v28 = vmul.f32 %v3108_v32, %v2996_v58 }
 0x117   :  { %2461 = vmatmul.mubr.f32.gmra.mrb[20].mxu1 %v629_v42  ;;  %v637_v42 = vmax.f32 %v605_v26, 0.0  ;;  %v638_v43 = vmax.f32 %v606_v35, 0.0  ;;  %v660_v26 = vmul.f32 %v3108_v32, %v2981_v41  ;;  %v661_v35 = vmul.f32 %v3108_v32, %v2990_v51 }
 0x118   :  { %2463 = vmatprep.mubr.f32.mxu1 %v630_v45  ;;  %v648_v45 = vmul.f32 %v3108_v32, %v2938_v8  ;;  %v3127_v8 = vld [vmem:[%s3521_s5] ss:$0 sm:$0xff] }
 0x119   :  { %v686_v56 = vadd.f32 %v3127_v8, %v647_v48  ;;  %v689_v11 = vadd.f32 %v3127_v8, %v650_v49  ;;  %v688_v14 = vadd.f32 %v3127_v8, %v649_v47  ;;  %v690_v13 = vadd.f32 %v3127_v8, %v651_v53 }
 0x11a   :  { %v687_v9 = vadd.f32 %v3127_v8, %v648_v45  ;;  %v693_v20 = vadd.f32 %v3127_v8, %v654_v55  ;;  %v692_v15 = vadd.f32 %v3127_v8, %v653_v6  ;;  %v3150_v29 = vadd.f32 %v3127_v8, %v656_v7 }
 0x11b   :  { %2464 = vmatmul.mubr.f32.gmra.mrb[22].mxu1 %v631_v50  ;;  %v652_v50 = vmul.f32 %v3108_v32, %v2944_v12  ;;  %v3166_v45 = vadd.f32 %v3127_v8, %v658_v0  ;;  %v3181_v55 = vadd.f32 %v3127_v8, %v661_v35 }
 0x11c   :  { %2466 = vmatprep.mubr.f32.mxu1 %v632_v57 }
 0x11d   :  { %v691_v57 = vadd.f32 %v3127_v8, %v652_v50 }
 0x11f   :  { %2467 = vmatmul.mubr.f32.gmra.mrb[24].mxu1 %v633_v63 }
 0x120   :  { %2469 = vmatprep.mubr.f32.mxu1 %v634_v16  ;;  %v657_v16 = vmul.f32 %v3108_v32, %v2960_v25  ;;  %v664_v25 = vmul.f32 %v3108_v32, %v3010_v27  ;;  %v3172_v27 = vadd.f32 %v3127_v8, %v660_v26  ;;  %v667_v26 = vmul.f32 %v3108_v32, %v3029_v52 }
 0x122   :  { %v3169_v48 = vadd.f32 %v3127_v8, %v657_v16 }
 0x123   :  { %2470 = vmatmul.mubr.f32.gmra.mrb[26].mxu1 %v635_v34  ;;  %v659_v34 = vmul.f32 %v3108_v32, %v2971_v33  ;;  %v663_v33 = vmul.f32 %v3108_v32, %v3004_v1  ;;  %v3178_v1 = vadd.f32 %v3127_v8, %v662_v28 }
 0x124   :  { %2472 = vmatprep.mubr.f32.mxu1 %v636_v37 }
 0x125   :  { %v3175_v53 = vadd.f32 %v3127_v8, %v659_v34 }
 0x127   :  { %2473 = vmatmul.mubr.f32.gmra.mrb[28].mxu1 %v637_v42 }
 0x128   :  { %2475 = vmatprep.mubr.f32.mxu1 %v638_v43 }
 0x12b   :  { %2476 = vmatmul.mubr.f32.gmra.mrb[30].mxu1 %v639_v22  ;;  %v694_v22 = vadd.f32 %v3127_v8, %v655_v60 }
 0x1c2   :  { %v2432_v12 = vpop.f32.mrb[0].mxu1 }
 0x1c3   :  { %v960_v62 = vadd.f32 %v2432_v12, %v687_v9  ;;  %v800_v63 = vpop.f32.mrb[1].mxu1 }
 0x1c4   :  { %v959_v4 = vadd.f32 %v800_v63, %v686_v56  ;;  %v3185_v56 = vadd.f32 %v3127_v8, %v664_v25  ;;  %v665_v63 = vmul.f32 %v3108_v32, %v3015_v39 }
 0x1c5   :  { %v992_v17 = vmax.f32 %v960_v62, 0.0  ;;  %v3191_v62 = vadd.f32 %v3127_v8, %v663_v33 }
 0x1c6   :  { %v991_v37 = vmax.f32 %v959_v4, 0.0  ;;  %v2435_v38 = vpop.f32.mrb[2].mxu1 }
 0x1c7   :  { %v1025_v41 = vsel %vm1023_vm1, %v992_v17, -inf  ;;  %v962_v42 = vadd.f32 %v2435_v38, %v689_v11  ;;  %v810_v43 = vpop.f32.mrb[3].mxu1  ;;  %v666_v11 = vmul.f32 %v3108_v32, %v3022_v44  ;;  %v670_v44 = vmul.f32 %v3108_v32, %v3047_v36 }
 0x1c8   :  { %v1024_v23 = vsel %vm1023_vm1, %v991_v37, -inf  ;;  %v961_v58 = vadd.f32 %v810_v43, %v688_v14  ;;  %v669_v38 = vmul.f32 %v3108_v32, %v3041_v18  ;;  %v3215_v18 = vadd.f32 %v3127_v8, %v667_v26 }
 0x1c9   :  { %v1026_v51 = vmax.f32 %v1024_v23, %v1025_v41  ;;  %v994_v47 = vmax.f32 %v962_v42, 0.0  ;;  %v3206_v41 = vadd.f32 %v3127_v8, %v666_v11 }
 0x1ca   :  { %v993_v49 = vmax.f32 %v961_v58, 0.0  ;;  %v2438_v50 = vpop.f32.mrb[4].mxu1  ;;  %v3209_v58 = vadd.f32 %v3127_v8, %v665_v63  ;;  %v3224_v63 = vadd.f32 %v3127_v8, %v669_v38 }
 0x1cb   :  { %v1027_v6 = vrot.slane %v1026_v51, 4  ;;  %v1034_v7 = vsel %vm1023_vm1, %v994_v47, -inf  ;;  %v964_v9 = vadd.f32 %v2438_v50, %v691_v57  ;;  %v820_v12 = vpop.f32.mrb[5].mxu1  ;;  %v668_v57 = vmul.f32 %v3108_v32, %v3033_v61 }
 0x1cc   :  { %v1033_v14 = vsel %vm1023_vm1, %v993_v49, -inf  ;;  %v963_v60 = vadd.f32 %v820_v12, %v690_v13  ;;  %v3219_v50 = vadd.f32 %v3127_v8, %v670_v44 }
 0x1cd   :  { %v1028_v0 = vmax.f32 %v1026_v51, %v1027_v6  ;;  %v1035_v4 = vmax.f32 %v1033_v14, %v1034_v7  ;;  %v996_v16 = vmax.f32 %v964_v9, 0.0 }
 0x1ce   :  { %v995_v17 = vmax.f32 %v963_v60, 0.0  ;;  %v2441_v13 = vpop.f32.mrb[6].mxu1 }
 0x1cf   :  { %v1029_v34 = vrot.slane %v1028_v0, 2  ;;  %v1036_v28 = vrot.slane %v1035_v4, 4  ;;  %v1043_v35 = vsel %vm1023_vm1, %v996_v16, -inf  ;;  %v966_v37 = vadd.f32 %v2441_v13, %v693_v20  ;;  %v830_v39 = vpop.f32.mrb[7].mxu1 }
 0x1d0   :  { %v1042_v25 = vsel %vm1023_vm1, %v995_v17, -inf  ;;  %v965_v61 = vadd.f32 %v830_v39, %v692_v15  ;;  %v3212_v20 = vadd.f32 %v3127_v8, %v668_v57 }
 0x1d1   :  { %v1030_v52 = vmax.f32 %v1028_v0, %v1029_v34  ;;  %v1037_v42 = vmax.f32 %v1035_v4, %v1036_v28  ;;  %v1044_v36 = vmax.f32 %v1042_v25, %v1043_v35  ;;  %v998_v43 = vmax.f32 %v966_v37, 0.0 }
 0x1d2   :  { %v997_v33 = vmax.f32 %v965_v61, 0.0  ;;  %v2444_v23 = vpop.f32.mrb[8].mxu1  ;;  %v672_v0 = vmul.f32 %v3108_v32, %v3060_v54  ;;  %v671_v25 = vmul.f32 %v3108_v32, %v3055_v30 }
 0x1d3   :  { %v1038_v51 = vrot.slane %v1037_v42, 2  ;;  %v1045_v15 = vrot.slane %v1044_v36, 4  ;;  %v1052_v47 = vsel %vm1023_vm1, %v998_v43, -inf  ;;  %v840_v49 = vpop.f32.mrb[9].mxu1  ;;  %v1031_v6 = vrot.slane %v1030_v52, 1 }
 0x1d4   :  { %v1051_v7 = vsel %vm1023_vm1, %v997_v33, -inf  ;;  %v968_v9 = vadd.f32 %v2444_v23, %v3150_v29  ;;  %v967_v12 = vadd.f32 %v840_v49, %v694_v22 }
 0x1d5   :  { %v1039_v11 = vmax.f32 %v1037_v42, %v1038_v51  ;;  %v1046_v14 = vmax.f32 %v1044_v36, %v1045_v15  ;;  %v1053_v60 = vmax.f32 %v1051_v7, %v1052_v47  ;;  %v1032_v22 = vmax.f32 %v1030_v52, %v1031_v6 }
 0x1d6   :  { %v1000_v4 = vmax.f32 %v968_v9, 0.0  ;;  %v999_v16 = vmax.f32 %v967_v12, 0.0  ;;  %v2447_v57 = vpop.f32.mrb[10].mxu1 }
 0x1d7   :  { %v1040_v26 = vrot.slane %v1039_v11, 1  ;;  %v1047_v44 = vrot.slane %v1046_v14, 2  ;;  %v1054_v17 = vrot.slane %v1053_v60, 4  ;;  %v970_v13 = vadd.f32 %v2447_v57, %v3166_v45  ;;  %v850_v29 = vpop.f32.mrb[11].mxu1 }
 0x1d8   :  { %v1061_v34 = vsel %vm1023_vm1, %v1000_v4, -inf  ;;  %v1060_v28 = vsel %vm1023_vm1, %v999_v16, -inf  ;;  %v969_v35 = vadd.f32 %v850_v29, %v3169_v48 }
 0x1d9   :  { %v1041_v37 = vmax.f32 %v1039_v11, %v1040_v26  ;;  %v1048_v39 = vmax.f32 %v1046_v14, %v1047_v44  ;;  %v1055_v54 = vmax.f32 %v1053_v60, %v1054_v17  ;;  %v1062_v38 = vmax.f32 %v1060_v28, %v1061_v34 }
 0x1da   :  { %v1002_v61 = vmax.f32 %v970_v13, 0.0  ;;  %v1001_v42 = vmax.f32 %v969_v35, 0.0  ;;  %v2450_v36 = vpop.f32.mrb[12].mxu1  ;;  %v3240_v14 = vadd.f32 %v3127_v8, %v672_v0 }
 0x1db   :  { %v1193_v45 = vsel %vm1192_vm2, %v1041_v37, %v1032_v22  ;;  %v1049_v52 = vrot.slane %v1048_v39, 1  ;;  %v1056_v43 = vrot.slane %v1055_v54, 2  ;;  %v1063_v33 = vrot.slane %v1062_v38, 4  ;;  %v860_v23 = vpop.f32.mrb[13].mxu1 }
 0x1dc   :  { %v1070_v51 = vsel %vm1023_vm1, %v1002_v61, -inf  ;;  %v1069_v48 = vsel %vm1023_vm1, %v1001_v42, -inf  ;;  %v972_v15 = vadd.f32 %v2450_v36, %v3172_v27  ;;  %v971_v47 = vadd.f32 %v860_v23, %v3175_v53 }
 0x1dd   :  { %v1050_v49 = vmax.f32 %v1048_v39, %v1049_v52  ;;  %v1057_v30 = vmax.f32 %v1055_v54, %v1056_v43  ;;  %v1064_v6 = vmax.f32 %v1062_v38, %v1063_v33  ;;  %v1071_v7 = vmax.f32 %v1069_v48, %v1070_v51 }
 0x1de   :  { %v1004_v9 = vmax.f32 %v972_v15, 0.0  ;;  %v1003_v12 = vmax.f32 %v971_v47, 0.0  ;;  %v2453_v11 = vpop.f32.mrb[14].mxu1  ;;  %v3248_v37 = vadd.f32 %v3127_v8, %v671_v25  ;;  %v674_v23 = vmul.f32 %v3108_v32, %v3074_v31 }
 0x1df   :  { %v1195_v60 = vsel %vm1194_vm3, %v1050_v49, %v1193_v45  ;;  %v1058_v4 = vrot.slane %v1057_v30, 1  ;;  %v1065_v16 = vrot.slane %v1064_v6, 2  ;;  %v1072_v57 = vrot.slane %v1071_v7, 4  ;;  %v870_v26 = vpop.f32.mrb[15].mxu1 }
 0x1e0   :  { %v1079_v27 = vsel %vm1023_vm1, %v1004_v9, -inf  ;;  %v1078_v53 = vsel %vm1023_vm1, %v1003_v12, -inf  ;;  %v974_v44 = vadd.f32 %v2453_v11, %v3178_v1  ;;  %v973_v17 = vadd.f32 %v870_v26, %v3181_v55 }
 0x1e1   :  { %v1059_v13 = vmax.f32 %v1057_v30, %v1058_v4  ;;  %v1066_v29 = vmax.f32 %v1064_v6, %v1065_v16  ;;  %v1073_v22 = vmax.f32 %v1071_v7, %v1072_v57  ;;  %v1080_v34 = vmax.f32 %v1078_v53, %v1079_v27 }
 0x1e2   :  { %v1006_v0 = vmax.f32 %v974_v44, 0.0  ;;  %v1005_v28 = vmax.f32 %v973_v17, 0.0  ;;  %v2456_v35 = vpop.f32.mrb[16].mxu1  ;;  %v673_v16 = vmul.f32 %v3108_v32, %v3066_v2 }
 0x1e3   :  { %v1067_v39 = vrot.slane %v1066_v29, 1  ;;  %v1074_v54 = vrot.slane %v1073_v22, 2  ;;  %v1081_v38 = vrot.slane %v1080_v34, 4  ;;  %v976_v61 = vadd.f32 %v2456_v35, %v3185_v56  ;;  %v880_v42 = vpop.f32.mrb[17].mxu1 }
 0x1e4   :  { %v1088_v1 = vsel %vm1023_vm1, %v1006_v0, -inf  ;;  %v1087_v55 = vsel %vm1023_vm1, %v1005_v28, -inf  ;;  %v975_v36 = vadd.f32 %v880_v42, %v3191_v62  ;;  %v1197_v45 = vsel %vm1196_vm4, %v1059_v13, %v1195_v60 }
 0x1e5   :  { %v1068_v52 = vmax.f32 %v1066_v29, %v1067_v39  ;;  %v1075_v43 = vmax.f32 %v1073_v22, %v1074_v54  ;;  %v1082_v33 = vmax.f32 %v1080_v34, %v1081_v38  ;;  %v1089_v25 = vmax.f32 %v1087_v55, %v1088_v1 }
 0x1e6   :  { %v1008_v51 = vmax.f32 %v976_v61, 0.0  ;;  %v1007_v48 = vmax.f32 %v975_v36, 0.0  ;;  %v2459_v15 = vpop.f32.mrb[18].mxu1  ;;  %v713_v61 = vadd.f32 %v3127_v8, %v674_v23  ;;  %v676_v23 = vmul.f32 %v3108_v32, %v3083_v46 }
 0x1e7   :  { %v1076_v56 = vrot.slane %v1075_v43, 1  ;;  %v1083_v47 = vrot.slane %v1082_v33, 2  ;;  %v1090_v49 = vrot.slane %v1089_v25, 4  ;;  %v978_v30 = vadd.f32 %v2459_v15, %v3206_v41  ;;  %v890_v6 = vpop.f32.mrb[19].mxu1 }
 0x1e8   :  { %v1097_v62 = vsel %vm1023_vm1, %v1008_v51, -inf  ;;  %v1096_v7 = vsel %vm1023_vm1, %v1007_v48, -inf  ;;  %v977_v9 = vadd.f32 %v890_v6, %v3209_v58  ;;  %v1199_v12 = vsel %vm1198_vm5, %v1068_v52, %v1197_v45 }
 0x1e9   :  { %v1077_v11 = vmax.f32 %v1075_v43, %v1076_v56  ;;  %v1084_v31 = vmax.f32 %v1082_v33, %v1083_v47  ;;  %v1091_v60 = vmax.f32 %v1089_v25, %v1090_v49  ;;  %v1098_v4 = vmax.f32 %v1096_v7, %v1097_v62 }
 0x1ea   :  { %v1010_v57 = vmax.f32 %v978_v30, 0.0  ;;  %v1009_v26 = vmax.f32 %v977_v9, 0.0  ;;  %v2462_v27 = vpop.f32.mrb[20].mxu1 }
 0x1eb   :  { %v1085_v41 = vrot.slane %v1084_v31, 1  ;;  %v1092_v53 = vrot.slane %v1091_v60, 2  ;;  %v1099_v44 = vrot.slane %v1098_v4, 4  ;;  %v980_v17 = vadd.f32 %v2462_v27, %v3212_v20  ;;  %v900_v13 = vpop.f32.mrb[21].mxu1 }
 0x1ec   :  { %v1106_v58 = vsel %vm1023_vm1, %v1010_v57, -inf  ;;  %v1105_v29 = vsel %vm1023_vm1, %v1009_v26, -inf  ;;  %v979_v22 = vadd.f32 %v900_v13, %v3215_v18  ;;  %v1201_v34 = vsel %vm1200_vm6, %v1077_v11, %v1199_v12 }
 0x1ed   :  { %v1086_v0 = vmax.f32 %v1084_v31, %v1085_v41  ;;  %v1093_v2 = vmax.f32 %v1091_v60, %v1092_v53  ;;  %v1100_v28 = vmax.f32 %v1098_v4, %v1099_v44  ;;  %v1107_v35 = vmax.f32 %v1105_v29, %v1106_v58 }
 0x1ee   :  { %v1012_v39 = vmax.f32 %v980_v17, 0.0  ;;  %v1011_v54 = vmax.f32 %v979_v22, 0.0  ;;  %v2465_v38 = vpop.f32.mrb[22].mxu1  ;;  %v712_v60 = vadd.f32 %v3127_v8, %v673_v16  ;;  %v715_v27 = vadd.f32 %v3127_v8, %v676_v23 }
 0x1ef   :  { %v1101_v20 = vrot.slane %v1100_v28, 2  ;;  %v1108_v42 = vrot.slane %v1107_v35, 4  ;;  %v982_v1 = vadd.f32 %v2465_v38, %v3219_v50  ;;  %v910_v55 = vpop.f32.mrb[23].mxu1  ;;  %v1094_v36 = vrot.slane %v1093_v2, 1 }
 0x1f0   :  { %v1115_v18 = vsel %vm1023_vm1, %v1012_v39, -inf  ;;  %v1114_v45 = vsel %vm1023_vm1, %v1011_v54, -inf  ;;  %v981_v52 = vadd.f32 %v910_v55, %v3224_v63  ;;  %v1203_v43 = vsel %vm1202_vm7, %v1086_v0, %v1201_v34 }
 0x1f1   :  { %v1102_v33 = vmax.f32 %v1100_v28, %v1101_v20  ;;  %v1109_v25 = vmax.f32 %v1107_v35, %v1108_v42  ;;  %v1116_v51 = vmax.f32 %v1114_v45, %v1115_v18  ;;  %v1014_v48 = vmax.f32 %v982_v1, 0.0 }
 0x1f2   :  { %v675_v50 = vmul.f32 %v3108_v32, %v3080_v40  ;;  %v1013_v15 = vmax.f32 %v981_v52, 0.0  ;;  %v2468_v56 = vpop.f32.mrb[24].mxu1  ;;  %v1095_v47 = vmax.f32 %v1093_v2, %v1094_v36  ;;  %v678_v28 = vmul.f32 %v3108_v32, %v3095_v5 }
 0x1f3   :  { %v1103_v49 = vrot.slane %v1102_v33, 1  ;;  %v1110_v30 = vrot.slane %v1109_v25, 2  ;;  %v1117_v6 = vrot.slane %v1116_v51, 4  ;;  %v1124_v63 = vsel %vm1023_vm1, %v1014_v48, -inf  ;;  %v920_v62 = vpop.f32.mrb[25].mxu1 }
 0x1f4   :  { %v1123_v7 = vsel %vm1023_vm1, %v1013_v15, -inf  ;;  %v984_v9 = vadd.f32 %v2468_v56, %v3240_v14  ;;  %v983_v12 = vadd.f32 %v920_v62, %v3248_v37  ;;  %v1205_v46 = vsel %vm1204_vm8, %v1095_v47, %v1203_v43 }
 0x1f5   :  { %v1111_v11 = vmax.f32 %v1109_v25, %v1110_v30  ;;  %v1118_v31 = vmax.f32 %v1116_v51, %v1117_v6  ;;  %v1125_v40 = vmax.f32 %v1123_v7, %v1124_v63  ;;  %2480 = vmatprep.mubr.msk.f32.mxu0 %vm1023_vm1, %v1205_v46  ;;  %v714_v41 = vadd.f32 %v3127_v8, %v675_v50 }
 0x1f6   :  { %v1016_v4 = vmax.f32 %v984_v9, 0.0  ;;  %v1015_v57 = vmax.f32 %v983_v12, 0.0  ;;  %v2471_v26 = vpop.f32.mrb[26].mxu1  ;;  %v1104_v13 = vmax.f32 %v1102_v33, %v1103_v49  ;;  %v677_v35 = vmul.f32 %v3108_v32, %v3090_v59 }
 0x1f7   :  { %v1112_v53 = vrot.slane %v1111_v11, 1  ;;  %v1119_v14 = vrot.slane %v1118_v31, 2  ;;  %v1126_v44 = vrot.slane %v1125_v40, 4  ;;  %v986_v37 = vadd.f32 %v2471_v26, %v713_v61  ;;  %v930_v17 = vpop.f32.mrb[27].mxu1 }
 0x1f8   :  { %v1133_v58 = vsel %vm1023_vm1, %v1016_v4, -inf  ;;  %v1132_v29 = vsel %vm1023_vm1, %v1015_v57, -inf  ;;  %v985_v22 = vadd.f32 %v930_v17, %v712_v60  ;;  %v717_v51 = vadd.f32 %v3127_v8, %v678_v28 }
 0x1f9   :  { %v1113_v34 = vmax.f32 %v1111_v11, %v1112_v53  ;;  %v1120_v16 = vmax.f32 %v1118_v31, %v1119_v14  ;;  %v1127_v0 = vmax.f32 %v1125_v40, %v1126_v44  ;;  %v1134_v2 = vmax.f32 %v1132_v29, %v1133_v58 }
 0x1fa   :  { %v1018_v39 = vmax.f32 %v986_v37, 0.0  ;;  %v1017_v54 = vmax.f32 %v985_v22, 0.0  ;;  %v2474_v38 = vpop.f32.mrb[28].mxu1  ;;  %v716_v23 = vadd.f32 %v3127_v8, %v677_v35  ;;  %v1292_v35 = vld [vmem:[%s3525_s9] sm:$0xff] }
 0x1fb   :  { %v1206_v61 = vsel %vm1192_vm2, %v1113_v34, %v1104_v13  ;;  %v1121_v20 = vrot.slane %v1120_v16, 1  ;;  %v1128_v42 = vrot.slane %v1127_v0, 2  ;;  %v1135_v1 = vrot.slane %v1134_v2, 4  ;;  %v940_v55 = vpop.f32.mrb[29].mxu1 }
 0x1fc   :  { %v1142_v36 = vsel %vm1023_vm1, %v1018_v39, -inf  ;;  %v1141_v18 = vsel %vm1023_vm1, %v1017_v54, -inf  ;;  %v988_v45 = vadd.f32 %v2474_v38, %v715_v27  ;;  %v987_v52 = vadd.f32 %v940_v55, %v714_v41  ;;  %v1293_v39 = vld [vmem:[%s3525_s9 + $0x8] sm:$0xff] }
 0x1fd   :  { %v1122_v43 = vmax.f32 %v1120_v16, %v1121_v20  ;;  %v1129_v5 = vmax.f32 %v1127_v0, %v1128_v42  ;;  %v1136_v33 = vmax.f32 %v1134_v2, %v1135_v1  ;;  %v1143_v25 = vmax.f32 %v1141_v18, %v1142_v36  ;;  %v1294_v42 = vld [vmem:[%s3525_s9 + $0x10] sm:$0xff]  ;;  %v1295_v1 = vld [vmem:[%s3525_s9 + $0x18] sm:$0xff] }
 0x1fe   :  { %v1020_v59 = vmax.f32 %v988_v45, 0.0  ;;  %v1019_v32 = vmax.f32 %v987_v52, 0.0  ;;  %v2477_v48 = vpop.f32.mrb[30].mxu1  ;;  %v3314_v20 = vpack.c.bf16 %v1293_v39, %v1292_v35  ;;  %v3325_v36 = vpack.c.bf16 %v1295_v1, %v1294_v42  ;;  %v2277_v45 = vld [vmem:[%s3524_s8] ss:$0 sm:$0xff]  ;;  %s2742_s8 = smov 96  }
 0x1ff   :  { %v1207_v50 = vsel %vm1194_vm3, %v1122_v43, %v1206_v61  ;;  %v1130_v15 = vrot.slane %v1129_v5, 1  ;;  %v1137_v56 = vrot.slane %v1136_v33, 2  ;;  %v1144_v47 = vrot.slane %v1143_v25, 4  ;;  %v950_v49 = vpop.f32.mrb[31].mxu1 }
 0x200   :  { %v1151_v30 = vsel %vm1023_vm1, %v1020_v59, -inf  ;;  %v1150_v6 = vsel %vm1023_vm1, %v1019_v32, -inf  ;;  %v990_v63 = vadd.f32 %v2477_v48, %v717_v51  ;;  %v989_v62 = vadd.f32 %v950_v49, %v716_v23 }
 0x201   :  { %v1131_v7 = vmax.f32 %v1129_v5, %v1130_v15  ;;  %v1138_v9 = vmax.f32 %v1136_v33, %v1137_v56  ;;  %v1145_v12 = vmax.f32 %v1143_v25, %v1144_v47  ;;  %v1152_v46 = vmax.f32 %v1150_v6, %v1151_v30  ;;  %v3347_v33 = vld [vmem:[%s3526_s10] ss:$0 sm:$0xff] }
 0x202   :  { %v1022_v11 = vmax.f32 %v990_v63, 0.0  ;;  %v1021_v31 = vmax.f32 %v989_v62, 0.0  ;;  %v2740_v18 = vmov 0.0  }
 0x203   :  { %v1208_v8 = vsel %vm1196_vm4, %v1131_v7, %v1207_v50  ;;  %v1139_v40 = vrot.slane %v1138_v9, 1  ;;  %v1146_v60 = vrot.slane %v1145_v12, 2  ;;  %v1153_v4 = vrot.slane %v1152_v46, 4 }
 0x204   :  { %v1160_v57 = vsel %vm1023_vm1, %v1022_v11, -inf  ;;  %v1159_v26 = vsel %vm1023_vm1, %v1021_v31, -inf }
 0x205   :  { %v1140_v27 = vmax.f32 %v1138_v9, %v1139_v40  ;;  %v1147_v41 = vmax.f32 %v1145_v12, %v1146_v60  ;;  %v1154_v53 = vmax.f32 %v1152_v46, %v1153_v4  ;;  %v1161_v14 = vmax.f32 %v1159_v26, %v1160_v57 }
 0x207   :  { %v1148_v44 = vrot.slane %v1147_v41, 1  ;;  %v1155_v37 = vrot.slane %v1154_v53, 2  ;;  %v1162_v17 = vrot.slane %v1161_v14, 4  ;;  %v1209_v13 = vsel %vm1198_vm5, %v1140_v27, %v1208_v8 }
 0x209   :  { %v1149_v58 = vmax.f32 %v1147_v41, %v1148_v44  ;;  %v1156_v29 = vmax.f32 %v1154_v53, %v1155_v37  ;;  %v1163_v22 = vmax.f32 %v1161_v14, %v1162_v17 }
 0x20b   :  { %v1157_v34 = vrot.slane %v1156_v29, 1  ;;  %v1164_v16 = vrot.slane %v1163_v22, 2  ;;  %v1210_v0 = vsel %vm1200_vm6, %v1149_v58, %v1209_v13 }
 0x20d   :  { %v1158_v2 = vmax.f32 %v1156_v29, %v1157_v34  ;;  %v1165_v28 = vmax.f32 %v1163_v22, %v1164_v16 }
 0x20f   :  { %v1166_v54 = vrot.slane %v1165_v28, 1  ;;  %v1211_v38 = vsel %vm1202_vm7, %v1158_v2, %v1210_v0 }
 0x211   :  { %v1167_v61 = vmax.f32 %v1165_v28, %v1166_v54 }
 0x213   :  { %v1212_v55 = vsel %vm1204_vm8, %v1167_v61, %v1211_v38 }
 0x214   :  { %2481 = vmatmul.mubr.msk.f32.vlgmr.msra.gmra.mrb[2].mxu0 %vm1023_vm1, %v1212_v55 }
 0x215   :  { %2609 = vmatpush3.bf16.msra.mxu0 %v3314_v20  ;;  %2491 = vmatprep.mubr.msk.f32.mxu0 %vm2739_vm9, %v2740_v18 }
 0x216   :  { %2610 = vmatprep.subr.bf16.mxu0 %v2738_v24 }
 0x219   :  { %2612 = vmatpush3.bf16.msra.mxu0 %v3325_v36 }
 0x21a   :  { %2613 = vmatprep.subr.bf16.mxu0 %v2738_v24 }
 0x21c   :  { %2492 = vmatmul.mubr.f32.vlgmr.msra.gmra.mrb[4].mxu0 %v2740_v18 }
 0x21d   :  { %2615 = vmatpush3.bf16.msra.mxu0 %v3314_v20  ;;  %2502 = vmatprep.mubr.msk.f32.mxu0 %vm2739_vm9, %v2740_v18 }
 0x21e   :  { %2616 = vmatprep.subr.bf16.mxu0 %v2738_v24 }
 0x221   :  { %2618 = vmatpush3.bf16.msra.mxu0 %v3325_v36 }
 0x222   :  { %2619 = vmatprep.subr.bf16.mxu0 %v2738_v24 }
 0x2e7   :  { %v2482_v52 = vpop.f32.mrb[2].mxu0 }
 0x2e8   :  { %v3342_v43 = vadd.f32 %v2482_v52, %v2277_v45  ;;  %v1283_v5 = vpop.f32.mrb[3].mxu0 }
 0x2e9   :  { %v3351_v51 = vadd.f32 %v2277_v45, %v1283_v5 }
 0x2ef   :  { %v1374_v25 = vpop.f32.mrb[4].mxu0 }
 0x2f0   :  { %v1375_v59 = vadd.f32 %v3347_v33, %v1374_v25  ;;  %v2493_v32 = vpop.f32.mrb[5].mxu0 }
 0x2f2   :  { %1386 = vrot.lane.b32.xlu0 %v1375_v59, %s2741_s28  ;;  %v1378_v48 = vadd.f32 %v1375_v59, %v3351_v51 }
 0x2f4   :  { %v2281_v23 = vmul.f32 -1.442695, %v1378_v48 }
 0x2f6   :  { %2664 = vpow2.f32 %v2281_v23 }
 0x300   :  { %v2665_v50 = vpop.eup %2664 }
 0x301   :  { %v1382_v15 = vadd.f32 1.0, %v2665_v50 }
 0x303   :  { %2666 = vrcp.f32 %v1382_v15 }
 0x30d   :  { %v2667_v56 = vpop.eup %2666 }
 0x30e   :  { %v1396_v62 = vsub.f32 1.0, %v2667_v56  ;;  %v1402_v9 = vmul.f32 0.0, %v2667_v56 }
 0x364   :  { %v1387_v47 = vpop.permute.xlu0 %1386 }
 0x365   :  { %v1389_v49 = vmul.f32 %v2667_v56, %v1387_v47 }
 0x367   :  { %1391 = vrot.lane.b32.xlu1 %v1389_v49, %s2741_s28 }
 0x3d9   :  { %v1392_v30 = vpop.permute.xlu1 %1391 }
 0x3da   :  { %v1394_v6 = vadd.f32 %v1392_v30, %v3351_v51 }
 0x3dc   :  { %2668 = vtanh.f32 %v1394_v6 }
 0x3e6   :  { %v2669_v63 = vpop.eup %2668 }
 0x3e7   :  { %1398 = vrot.lane.b32.xlu0 %v2669_v63, %s2742_s8 }
 0x459   :  { %v1399_v7 = vpop.permute.xlu0 %1398 }
 0x45a   :  { %v1401_v12 = vmul.f32 %v1399_v7, %v1396_v62 }
 0x45c   :  { %v3357_v46 = vadd.f32 %v1402_v9, %v1401_v12 }
 0x45e   :  { %1415 = vrot.lane.b32.xlu1 %v3357_v46, %s2742_s8  ;;  %v1515_v58 = vrot.slane %v3357_v46, 6 }
 0x4d0   :  { %v1416_v11 = vpop.permute.xlu1 %1415 }
 0x4d1   :  { %2503 = vmatmul.mubr.msk.f32.vlgmr.msra.gmra.mrb[6].mxu0 %vm1304_vm10, %v1416_v11 }
 0x4d2   :  { %2621 = vmatpush3.bf16.msra.mxu0 %v3314_v20  ;;  %2513 = vmatprep.mubr.msk.f32.mxu0 %vm2739_vm9, %v2740_v18 }
 0x4d3   :  { %2622 = vmatprep.subr.bf16.mxu0 %v2738_v24 }
 0x4d6   :  { %2624 = vmatpush3.bf16.msra.mxu0 %v3325_v36 }
 0x4d7   :  { %2625 = vmatprep.subr.bf16.mxu0 %v2738_v24 }
 0x5a4   :  { %v1485_v31 = vpop.f32.mrb[6].mxu0 }
 0x5a5   :  { %v1486_v8 = vadd.f32 %v3347_v33, %v1485_v31  ;;  %v2504_v40 = vpop.f32.mrb[7].mxu0 }
 0x5a7   :  { %v1490_v60 = vrot.slane %v1486_v8, 6 }
 0x5a9   :  { %1499 = vrot.lane.b32.xlu0 %v1490_v60, %s2741_s28  ;;  %v1492_v4 = vadd.f32 %v1490_v60, %v3351_v51 }
 0x5ab   :  { %v2283_v57 = vmul.f32 -1.442695, %v1492_v4 }
 0x5ad   :  { %2670 = vpow2.f32 %v2283_v57 }
 0x5b7   :  { %v2671_v26 = vpop.eup %2670 }
 0x5b8   :  { %v1496_v27 = vadd.f32 1.0, %v2671_v26 }
 0x5ba   :  { %2672 = vrcp.f32 %v1496_v27 }
 0x5c4   :  { %v2673_v41 = vpop.eup %2672 }
 0x5c5   :  { %v1509_v13 = vsub.f32 1.0, %v2673_v41  ;;  %v1517_v34 = vmul.f32 %v2673_v41, %v1515_v58 }
 0x61b   :  { %v1500_v53 = vpop.permute.xlu0 %1499 }
 0x61c   :  { %v1502_v14 = vmul.f32 %v2673_v41, %v1500_v53 }
 0x61e   :  { %1504 = vrot.lane.b32.xlu1 %v1502_v14, %s2741_s28 }
 0x690   :  { %v1505_v44 = vpop.permute.xlu1 %1504 }
 0x691   :  { %v1507_v37 = vadd.f32 %v1505_v44, %v3351_v51 }
 0x693   :  { %2674 = vtanh.f32 %v1507_v37 }
 0x69d   :  { %v2675_v17 = vpop.eup %2674 }
 0x69e   :  { %1511 = vrot.lane.b32.xlu0 %v2675_v17, %s2742_s8 }
 0x710   :  { %v1512_v29 = vpop.permute.xlu0 %1511 }
 0x711   :  { %v1514_v22 = vmul.f32 %v1512_v29, %v1509_v13 }
 0x713   :  { %v3375_v16 = vadd.f32 %v1517_v34, %v1514_v22 }
 0x715   :  { %v1533_v0 = vrot.slane %v3375_v16, 2  ;;  %v1634_v48 = vrot.slane %v3375_v16, 6 }
 0x717   :  { %1534 = vrot.lane.b32.xlu1 %v1533_v0, %s2742_s8 }
 0x789   :  { %v1535_v2 = vpop.permute.xlu1 %1534 }
 0x78a   :  { %2514 = vmatmul.mubr.msk.f32.vlgmr.msra.gmra.mrb[8].mxu0 %vm1304_vm10, %v1535_v2 }
 0x78b   :  { %2627 = vmatpush3.bf16.msra.mxu0 %v3314_v20  ;;  %2524 = vmatprep.mubr.msk.f32.mxu0 %vm2739_vm9, %v2740_v18 }
 0x78c   :  { %2628 = vmatprep.subr.bf16.mxu0 %v2738_v24 }
 0x78f   :  { %2630 = vmatpush3.bf16.msra.mxu0 %v3325_v36 }
 0x790   :  { %2631 = vmatprep.subr.bf16.mxu0 %v2738_v24 }
 0x85d   :  { %v1604_v28 = vpop.f32.mrb[8].mxu0 }
 0x85e   :  { %v1605_v35 = vadd.f32 %v3347_v33, %v1604_v28  ;;  %v2515_v39 = vpop.f32.mrb[9].mxu0 }
 0x860   :  { %v1609_v54 = vrot.slane %v1605_v35, 4 }
 0x862   :  { %1618 = vrot.lane.b32.xlu0 %v1609_v54, %s2741_s28  ;;  %v1611_v38 = vadd.f32 %v1609_v54, %v3351_v51 }
 0x864   :  { %v2285_v61 = vmul.f32 -1.442695, %v1611_v38 }
 0x866   :  { %2676 = vpow2.f32 %v2285_v61 }
 0x870   :  { %v2677_v42 = vpop.eup %2676 }
 0x871   :  { %v1615_v1 = vadd.f32 1.0, %v2677_v42 }
 0x873   :  { %2678 = vrcp.f32 %v1615_v1 }
 0x87d   :  { %v2679_v55 = vpop.eup %2678 }
 0x87e   :  { %v1628_v32 = vsub.f32 1.0, %v2679_v55  ;;  %v1636_v50 = vmul.f32 %v2679_v55, %v1634_v48 }
 0x8d4   :  { %v1619_v45 = vpop.permute.xlu0 %1618 }
 0x8d5   :  { %v1621_v52 = vmul.f32 %v2679_v55, %v1619_v45 }
 0x8d7   :  { %1623 = vrot.lane.b32.xlu1 %v1621_v52, %s2741_s28 }
 0x949   :  { %v1624_v5 = vpop.permute.xlu1 %1623 }
 0x94a   :  { %v1626_v25 = vadd.f32 %v1624_v5, %v3351_v51 }
 0x94c   :  { %2680 = vtanh.f32 %v1626_v25 }
 0x956   :  { %v2681_v59 = vpop.eup %2680 }
 0x957   :  { %1630 = vrot.lane.b32.xlu0 %v2681_v59, %s2742_s8 }
 0x9c9   :  { %v1631_v23 = vpop.permute.xlu0 %1630 }
 0x9ca   :  { %v1633_v15 = vmul.f32 %v1631_v23, %v1628_v32 }
 0x9cc   :  { %v3393_v56 = vadd.f32 %v1636_v50, %v1633_v15 }
 0x9ce   :  { %v1652_v47 = vrot.slane %v3393_v56, 4  ;;  %v1753_v27 = vrot.slane %v3393_v56, 6 }
 0x9d0   :  { %1653 = vrot.lane.b32.xlu1 %v1652_v47, %s2742_s8 }
 0xa42   :  { %v1654_v49 = vpop.permute.xlu1 %1653 }
 0xa43   :  { %2525 = vmatmul.mubr.msk.f32.vlgmr.msra.gmra.mrb[10].mxu0 %vm1304_vm10, %v1654_v49 }
 0xa44   :  { %2633 = vmatpush3.bf16.msra.mxu0 %v3314_v20  ;;  %2535 = vmatprep.mubr.msk.f32.mxu0 %vm2739_vm9, %v2740_v18 }
 0xa45   :  { %2634 = vmatprep.subr.bf16.mxu0 %v2738_v24 }
 0xa48   :  { %2636 = vmatpush3.bf16.msra.mxu0 %v3325_v36 }
 0xa49   :  { %2637 = vmatprep.subr.bf16.mxu0 %v2738_v24 }
 0xb16   :  { %v1723_v30 = vpop.f32.mrb[10].mxu0 }
 0xb17   :  { %v1724_v6 = vadd.f32 %v3347_v33, %v1723_v30  ;;  %v2526_v63 = vpop.f32.mrb[11].mxu0 }
 0xb19   :  { %v1728_v62 = vrot.slane %v1724_v6, 2 }
 0xb1b   :  { %1737 = vrot.lane.b32.xlu0 %v1728_v62, %s2741_s28  ;;  %v1730_v7 = vadd.f32 %v1728_v62, %v3351_v51 }
 0xb1d   :  { %v2287_v9 = vmul.f32 -1.442695, %v1730_v7 }
 0xb1f   :  { %2682 = vpow2.f32 %v2287_v9 }
 0xb29   :  { %v2683_v12 = vpop.eup %2682 }
 0xb2a   :  { %v1734_v11 = vadd.f32 1.0, %v2683_v12 }
 0xb2c   :  { %2684 = vrcp.f32 %v1734_v11 }
 0xb36   :  { %v2685_v31 = vpop.eup %2684 }
 0xb37   :  { %v1747_v26 = vsub.f32 1.0, %v2685_v31  ;;  %v1755_v53 = vmul.f32 %v2685_v31, %v1753_v27 }
 0xb8d   :  { %v1738_v8 = vpop.permute.xlu0 %1737 }
 0xb8e   :  { %v1740_v40 = vmul.f32 %v2685_v31, %v1738_v8 }
 0xb90   :  { %1742 = vrot.lane.b32.xlu1 %v1740_v40, %s2741_s28 }
 0xc02   :  { %v1743_v60 = vpop.permute.xlu1 %1742 }
 0xc03   :  { %v1745_v4 = vadd.f32 %v1743_v60, %v3351_v51 }
 0xc05   :  { %2686 = vtanh.f32 %v1745_v4 }
 0xc0f   :  { %v2687_v57 = vpop.eup %2686 }
 0xc10   :  { %1749 = vrot.lane.b32.xlu0 %v2687_v57, %s2742_s8 }
 0xc82   :  { %v1750_v41 = vpop.permute.xlu0 %1749 }
 0xc83   :  { %v1752_v14 = vmul.f32 %v1750_v41, %v1747_v26 }
 0xc85   :  { %v3411_v44 = vadd.f32 %v1755_v53, %v1752_v14 }
 0xc87   :  { %v1771_v37 = vrot.slane %v3411_v44, 6 }
 0xc89   :  { %1772 = vrot.lane.b32.xlu1 %v1771_v37, %s2742_s8 }
 0xcfb   :  { %v1773_v17 = vpop.permute.xlu1 %1772 }
 0xcfc   :  { %2536 = vmatmul.mubr.msk.f32.vlgmr.msra.gmra.mrb[12].mxu0 %vm1304_vm10, %v1773_v17 }
 0xcfd   :  { %2639 = vmatpush3.bf16.msra.mxu0 %v3314_v20  ;;  %2546 = vmatprep.mubr.msk.f32.mxu0 %vm2739_vm9, %v2740_v18 }
 0xcfe   :  { %2640 = vmatprep.subr.bf16.mxu0 %v2738_v24 }
 0xd01   :  { %2642 = vmatpush3.bf16.msra.mxu0 %v3325_v36 }
 0xd02   :  { %2643 = vmatprep.subr.bf16.mxu0 %v2738_v24 }
 0xdcf   :  { %v1842_v51 = vpop.f32.mrb[12].mxu0 }
 0xdd0   :  { %v1843_v13 = vadd.f32 %v3347_v33, %v1842_v51  ;;  %v2537_v58 = vpop.f32.mrb[13].mxu0 }
 0xdd2   :  { %1854 = vrot.lane.b32.xlu0 %v1843_v13, %s2741_s28  ;;  %v1846_v29 = vadd.f32 %v1843_v13, %v3342_v43 }
 0xdd4   :  { %v2289_v22 = vmul.f32 -1.442695, %v1846_v29 }
 0xdd6   :  { %2688 = vpow2.f32 %v2289_v22 }
 0xde0   :  { %v2689_v34 = vpop.eup %2688 }
 0xde1   :  { %v1850_v0 = vadd.f32 1.0, %v2689_v34 }
 0xde3   :  { %2690 = vrcp.f32 %v1850_v0 }
 0xded   :  { %v2691_v2 = vpop.eup %2690 }
 0xdee   :  { %v1864_v61 = vsub.f32 1.0, %v2691_v2  ;;  %v1871_v1 = vmul.f32 %v2691_v2, %v1771_v37 }
 0xe44   :  { %v1855_v28 = vpop.permute.xlu0 %1854 }
 0xe45   :  { %v1857_v35 = vmul.f32 %v2691_v2, %v1855_v28 }
 0xe47   :  { %1859 = vrot.lane.b32.xlu1 %v1857_v35, %s2741_s28 }
 0xeb9   :  { %v1860_v39 = vpop.permute.xlu1 %1859 }
 0xeba   :  { %v1862_v54 = vadd.f32 %v1860_v39, %v3342_v43 }
 0xebc   :  { %2692 = vtanh.f32 %v1862_v54 }
 0xec6   :  { %v2693_v38 = vpop.eup %2692 }
 0xec7   :  { %1866 = vrot.lane.b32.xlu0 %v2693_v38, %s2742_s8  ;;  %v1297_v38 = vld [vmem:[%s3527_s11] sm:$0xff]  ;;  %s2744_s11 = smov [#allocation2]  }
 0xec8   :  { %s2263_s13 = sshll.u32 %s2744_s11, 4  ;;  %s2264_s13 = int_to_ptr.vmem [resolvable:$true] %s2263_s13 }
 0xec9   :  { %s2712_s14 = scalar_lea.vmem %s2264_s13, 16  ;;  %s2716_s6 = scalar_lea.vmem %s2264_s13, 32 }
 0xeca   :  { %p2713_p0 = scmp.ne.s32.totalorder %s2264_s13, %s2712_s14  ;;  %p2717_p1 = scmp.lt.s32.totalorder %s2264_s13, %s2264_s13 }
 0xecb   :  { %p2718_p2 = scmp.lt.s32.totalorder %s2716_s6, %s2712_s14 }
 0xecd   :  { %p2719_p3 = por %p2718_p2, %p2717_p1 }
 0xecf   :  { %p2720_p4 = pnand %p2719_p3, %p2713_p0 }
 0xf39   :  { %v1867_v42 = vpop.permute.xlu0 %1866 }
 0xf3a   :  { %v1869_v55 = vmul.f32 %v1867_v42, %v1864_v61  ;;  %v1522_v42 = vrot.slane %v1297_v38, %v2859_v21 }
 0xf3c   :  { %v3428_v45 = vadd.f32 %v1871_v1, %v1869_v55  ;;  %v1640_v1 = vsub.s32 2, %v2829_v10 }
 0xf3e   :  { %1884 = vrot.lane.b32.xlu1 %v3428_v45, %s2742_s8  ;;  %v1984_v9 = vrot.slane %v3428_v45, 6  ;;  %v1641_v55 = vrot.slane %v1297_v38, %v1640_v1 }
 0xfb0   :  { %v1885_v52 = vpop.permute.xlu1 %1884 }
 0xfb1   :  { %2547 = vmatmul.mubr.msk.f32.vlgmr.msra.gmra.mrb[14].mxu0 %vm1304_vm10, %v1885_v52  ;;  %v1875_v52 = vsub.s32 4, %v2829_v10 }
 0xfb2   :  { %2645 = vmatpush3.bf16.msra.mxu0 %v3314_v20  ;;  %2557 = vmatprep.mubr.msk.f32.mxu0 %vm2739_vm9, %v2740_v18 }
 0xfb3   :  { %2646 = vmatprep.subr.bf16.mxu0 %v2738_v24 }
 0xfb6   :  { %2648 = vmatpush3.bf16.msra.mxu0 %v3325_v36 }
 0xfb7   :  { %2649 = vmatprep.subr.bf16.mxu0 %v2738_v24 }
0x1084   :  { %v1954_v5 = vpop.f32.mrb[14].mxu0 }
0x1085   :  { %v1955_v25 = vadd.f32 %v3347_v33, %v1954_v5  ;;  %v2548_v59 = vpop.f32.mrb[15].mxu0 }
0x1087   :  { %v1959_v32 = vrot.slane %v1955_v25, 6 }
0x1089   :  { %1968 = vrot.lane.b32.xlu0 %v1959_v32, %s2741_s28  ;;  %v1961_v48 = vadd.f32 %v1959_v32, %v3342_v43 }
0x108b   :  { %v2291_v23 = vmul.f32 -1.442695, %v1961_v48 }
0x108d   :  { %2694 = vpow2.f32 %v2291_v23 }
0x1097   :  { %v2695_v50 = vpop.eup %2694 }
0x1098   :  { %v1965_v15 = vadd.f32 1.0, %v2695_v50  ;;  %v1407_v50 = vrot.slane %v1297_v38, %v2854_v19 }
0x109a   :  { %2696 = vrcp.f32 %v1965_v15  ;;  %v1759_v15 = vsub.s32 3, %v2829_v10 }
0x10a4   :  { %v2697_v47 = vpop.eup %2696 }
0x10a5   :  { %v1978_v7 = vsub.f32 1.0, %v2697_v47  ;;  %v1986_v11 = vmul.f32 %v2697_v47, %v1984_v9 }
0x10fb   :  { %v1969_v49 = vpop.permute.xlu0 %1968 }
0x10fc   :  { %v1971_v30 = vmul.f32 %v2697_v47, %v1969_v49  ;;  %v1760_v47 = vrot.slane %v1297_v38, %v1759_v15  ;;  %v1990_v49 = vsub.s32 5, %v2829_v10 }
0x10fe   :  { %1973 = vrot.lane.b32.xlu1 %v1971_v30, %s2741_s28  ;;  %v1991_v30 = vrot.slane %v1297_v38, %v1990_v49 }
0x1170   :  { %v1974_v6 = vpop.permute.xlu1 %1973 }
0x1171   :  { %v1976_v63 = vadd.f32 %v1974_v6, %v3342_v43  ;;  %v2109_v6 = vsub.s32 6, %v2829_v10 }
0x1173   :  { %2698 = vtanh.f32 %v1976_v63  ;;  %v2110_v63 = vrot.slane %v1297_v38, %v2109_v6 }
0x117d   :  { %v2699_v62 = vpop.eup %2698 }
0x117e   :  { %1980 = vrot.lane.b32.xlu0 %v2699_v62, %s2742_s8 }
0x11f0   :  { %v1981_v12 = vpop.permute.xlu0 %1980 }
0x11f1   :  { %v1983_v31 = vmul.f32 %v1981_v12, %v1978_v7  ;;  %v2228_v7 = vsub.s32 7, %v2829_v10 }
0x11f3   :  { %v3446_v8 = vadd.f32 %v1986_v11, %v1983_v31  ;;  %v2229_v12 = vrot.slane %v1297_v38, %v2228_v7 }
0x11f5   :  { %v2002_v40 = vrot.slane %v3446_v8, 2  ;;  %v2103_v58 = vrot.slane %v3446_v8, 6 }
0x11f7   :  { %2003 = vrot.lane.b32.xlu1 %v2002_v40, %s2742_s8 }
0x1269   :  { %v2004_v60 = vpop.permute.xlu1 %2003 }
0x126a   :  { %2558 = vmatmul.mubr.msk.f32.vlgmr.msra.gmra.mrb[16].mxu0 %vm1304_vm10, %v2004_v60 }
0x126b   :  { %2651 = vmatpush3.bf16.msra.mxu0 %v3314_v20  ;;  %2568 = vmatprep.mubr.msk.f32.mxu0 %vm2739_vm9, %v2740_v18 }
0x126c   :  { %2652 = vmatprep.subr.bf16.mxu0 %v2738_v24 }
0x126f   :  { %2654 = vmatpush3.bf16.msra.mxu0 %v3325_v36 }
0x133d   :  { %v2073_v4 = vpop.f32.mrb[16].mxu0 }
0x133e   :  { %v2074_v57 = vadd.f32 %v3347_v33, %v2073_v4  ;;  %v2559_v26 = vpop.f32.mrb[17].mxu0 }
0x1340   :  { %v2078_v27 = vrot.slane %v2074_v57, 4 }
0x1342   :  { %2087 = vrot.lane.b32.xlu0 %v2078_v27, %s2741_s28  ;;  %v2080_v41 = vadd.f32 %v2078_v27, %v3342_v43 }
0x1344   :  { %v2293_v53 = vmul.f32 -1.442695, %v2080_v41 }
0x1346   :  { %2700 = vpow2.f32 %v2293_v53 }
0x1350   :  { %v2701_v14 = vpop.eup %2700 }
0x1351   :  { %v2084_v20 = vadd.f32 1.0, %v2701_v14 }
0x1353   :  { %2702 = vrcp.f32 %v2084_v20 }
0x135d   :  { %v2703_v37 = vpop.eup %2702 }
0x135e   :  { %v2097_v13 = vsub.f32 1.0, %v2703_v37  ;;  %v2105_v22 = vmul.f32 %v2703_v37, %v2103_v58 }
0x13b4   :  { %v2088_v18 = vpop.permute.xlu0 %2087 }
0x13b5   :  { %v2090_v17 = vmul.f32 %v2703_v37, %v2088_v18 }
0x13b7   :  { %2092 = vrot.lane.b32.xlu1 %v2090_v17, %s2741_s28 }
0x1429   :  { %v2093_v24 = vpop.permute.xlu1 %2092 }
0x142a   :  { %v2095_v36 = vadd.f32 %v2093_v24, %v3342_v43 }
0x142c   :  { %2704 = vtanh.f32 %v2095_v36 }
0x1436   :  { %v2705_v51 = vpop.eup %2704 }
0x1437   :  { %2099 = vrot.lane.b32.xlu0 %v2705_v51, %s2742_s8 }
0x14a9   :  { %v2100_v29 = vpop.permute.xlu0 %2099 }
0x14aa   :  { %v2102_v34 = vmul.f32 %v2100_v29, %v2097_v13 }
0x14ac   :  { %v3463_v0 = vadd.f32 %v2105_v22, %v2102_v34 }
0x14ae   :  { %v2121_v2 = vrot.slane %v3463_v0, 4  ;;  %v2222_v13 = vrot.slane %v3463_v0, 6 }
0x14b0   :  { %2122 = vrot.lane.b32.xlu1 %v2121_v2, %s2742_s8 }
0x1522   :  { %v2123_v28 = vpop.permute.xlu1 %2122 }
0x1523   :  { %2569 = vmatmul.mubr.msk.f32.vlgmr.msra.gmra.mrb[18].mxu0 %vm1304_vm10, %v2123_v28 }
0x15f6   :  { %v2192_v35 = vpop.f32.mrb[18].mxu0 }
0x15f7   :  { %v2193_v39 = vadd.f32 %v3347_v33, %v2192_v35  ;;  %v2570_v54 = vpop.f32.mrb[19].mxu0  ;;  %v1876_v33 = vrot.slane %v1297_v38, %v1875_v52 }
0x15f9   :  { %v2197_v61 = vrot.slane %v2193_v39, 2 }
0x15fb   :  { %2206 = vrot.lane.b32.xlu0 %v2197_v61, %s2741_s28  ;;  %v2199_v5 = vadd.f32 %v2197_v61, %v3342_v43 }
0x15fd   :  { %v2295_v25 = vmul.f32 -1.442695, %v2199_v5 }
0x15ff   :  { %1524 = vrot.lane.b32.xlu0 %v1522_v42, %s2743_s30  ;;  %2706 = vpow2.f32 %v2295_v25 }
0x1603   :  { %1643 = vrot.lane.b32.xlu0 %v1641_v55, %s2743_s30 }
0x1607   :  { %1878 = vrot.lane.b32.xlu0 %v1876_v33, %s2743_s30 }
0x1609   :  { %v2707_v59 = vpop.eup %2706 }
0x160a   :  { %v2203_v32 = vadd.f32 1.0, %v2707_v59 }
0x160c   :  { %2708 = vrcp.f32 %v2203_v32 }
0x1616   :  { %v2709_v21 = vpop.eup %2708 }
0x1617   :  { %v2224_v22 = vmul.f32 %v2709_v21, %v2222_v13 }
0x166d   :  { %v2207_v48 = vpop.permute.xlu0 %2206 }
0x166e   :  { %v2209_v23 = vmul.f32 %v2709_v21, %v2207_v48 }
0x1670   :  { %2211 = vrot.lane.b32.xlu1 %v2209_v23, %s2741_s28 }
0x1671   :  { %v1525_v31 = vpop.permute.xlu0 %1524 }
0x1672   :  { %v1527_v60 = vmul.f32 %v1525_v31, %v3375_v16 }
0x1674   :  { %1409 = vrot.lane.b32.xlu1 %v1407_v50, %s2743_s30  ;;  %v1529_v26 = vrot.slane %v1527_v60, 2 }
0x1675   :  { %v1644_v4 = vpop.permute.xlu0 %1643 }
0x1678   :  { %1762 = vrot.lane.b32.xlu1 %v1760_v47, %s2743_s30 }
0x1679   :  { %v1879_v18 = vpop.permute.xlu0 %1878 }
0x167a   :  { %v1881_v16 = vmul.f32 %v1879_v18, %v3428_v45 }
0x167c   :  { %1993 = vrot.lane.b32.xlu1 %v1991_v30, %s2743_s30 }
0x1680   :  { %2112 = vrot.lane.b32.xlu1 %v2110_v63, %s2743_s30 }
0x16e2   :  { %v2212_v62 = vpop.permute.xlu1 %2211 }
0x16e3   :  { %v2214_v19 = vadd.f32 %v2212_v62, %v3342_v43  ;;  %v1646_v43 = vmul.f32 %v1644_v4, %v3393_v56 }
0x16e5   :  { %2710 = vtanh.f32 %v2214_v19  ;;  %v1648_v14 = vrot.slane %v1646_v43, 4 }
0x16e6   :  { %v1410_v11 = vpop.permute.xlu1 %1409 }
0x16e7   :  { %v1412_v57 = vmul.f32 %v1410_v11, %v3357_v46  ;;  %v2216_v46 = vsub.f32 1.0, %v2709_v21 }
0x16e9   :  { %v1531_v53 = vadd.f32 %v1529_v26, %v1412_v57 }
0x16ea   :  { %v1763_v40 = vpop.permute.xlu1 %1762 }
0x16eb   :  { %v1765_v27 = vmul.f32 %v1763_v40, %v3411_v44  ;;  %v1650_v37 = vadd.f32 %v1648_v14, %v1531_v53 }
0x16ed   :  { %v1767_v20 = vrot.slane %v1765_v27, 6 }
0x16ee   :  { %v1994_v41 = vpop.permute.xlu1 %1993 }
0x16ef   :  { %v2711_v9 = vpop.eup %2710  ;;  %v1769_v24 = vadd.f32 %v1767_v20, %v1650_v37  ;;  %v1996_v36 = vmul.f32 %v1994_v41, %v3446_v8 }
0x16f0   :  { %2218 = vrot.lane.b32.xlu0 %v2711_v9, %s2742_s8 }
0x16f1   :  { %v1882_v58 = vadd.f32 %v1881_v16, %v1769_v24  ;;  %v1998_v44 = vrot.slane %v1996_v36, 2 }
0x16f2   :  { %v2113_v17 = vpop.permute.xlu1 %2112 }
0x16f3   :  { %v2115_v51 = vmul.f32 %v2113_v17, %v3463_v0  ;;  %v2000_v35 = vadd.f32 %v1998_v44, %v1882_v58  ;;  %v2249_v0 = vand.u32 127, %v50_v3 }
0x16f4   :  { %2231 = vrot.lane.b32.xlu0 %v2229_v12, %s2743_s30 }
0x16f5   :  { %v2117_v34 = vrot.slane %v2115_v51, 4  ;;  %v2252_v42 = vsub.s32 %v2249_v0, %v2829_v10 }
0x16f7   :  { %v2119_v54 = vadd.f32 %v2117_v34, %v2000_v35 }
0x1762   :  { %v2219_v56 = vpop.permute.xlu0 %2218 }
0x1763   :  { %v2221_v29 = vmul.f32 %v2219_v56, %v2216_v46 }
0x1765   :  { %v2225_v2 = vadd.f32 %v2224_v22, %v2221_v29 }
0x1766   :  { %v2232_v28 = vpop.permute.xlu0 %2231 }
0x1767   :  { %v2234_v39 = vmul.f32 %v2232_v28, %v2225_v2 }
0x1769   :  { %v2236_v38 = vrot.slane %v2234_v39, 6 }
0x176b   :  { %v2238_v8 = vadd.f32 %v2236_v38, %v2119_v54 }
0x176d   :  { %2240 = vrot.lane.b32.xlu1 %v2238_v8, %s2742_s8 }
0x17df   :  { %v2241_v45 = vpop.permute.xlu1 %2240 }
0x17e0   :  { %v2244_v61 = vsel %vm2243_vm11, %v2241_v45, 0.0 }
0x17e1   :  { %2245 = vadd.xlane.f32.xlu0 %v2244_v61 }
0x186e   :  { %v2246_v1 = vpop.xlane.xlu0 %2245 }
0x186f   :  { %v2253_v55 = vrot.slane %v2246_v1, %v2252_v42 }
0x1871   :  { %2256 = vst.msk [vmem:[#allocation2] sm:$0x1] %vm2255_vm12, %v2253_v55 }
0x1872   :  { %2723 = shalt.err (!%p2720_p4)
}
0x1873   :  { %s2724_s16 = scalar_lea.hbm %s3528_s12, 16 }
0x1874   :  { %p2725_p5 = scmp.ne.s32.totalorder %s3528_s12, %s2724_s16  ;;  %p2728_p6 = scmp.lt.u32.totalorder %s2724_s16, %s3528_s12 }
0x1876   :  { %p2730_p7 = pnand %p2728_p6, %p2725_p5 }
0x1878   :  { %2733 = shalt.err (!%p2730_p7)
}
0x1879   :  { %2266 = dma.vmem_to_hbm [thread:$0]  %s2264_s13, 16, %s3528_s12, [#allocation3]  }
0x187a   :  { %2734 = dma.done.wait [#allocation3], 16  }
0x187b   :  { %2735 = vsyncadd [#allocation3], 4294967280 }
0x187c   :  { %2270 = vsyncpa [#allocation3], 1 }

</bundles_post_ra>
